<compile_context>
chip_gen: v6e
topology: v6e:2x2x1
jax: 0.10.0
libtpu: 0.0.40
codegen_flags: <defaults>
</compile_context>

<pallas_src>
import functools
import numpy as np
import jax
import jax.numpy as jnp
from jax import lax
from jax.experimental import pallas as pl
from jax.experimental.pallas import tpu as pltpu

WINDOW_SIZE = 11
PAD = WINDOW_SIZE // 2
_FIVE = 5  # number of SSIM conv operands: x, y, x^2, y^2, x*y


# ------------------------- host-side constant helpers -------------------------
def _round_to_bf16(x):
    """Round-to-nearest-even f32 -> bf16 -> f32, done host-side with numpy."""
    x = np.atleast_1d(np.asarray(x, dtype=np.float32))
    u = x.view(np.uint32).astype(np.uint64)
    u = (u + np.uint64(0x7FFF) + ((u >> np.uint64(16)) & np.uint64(1))) \
        & np.uint64(0xFFFF0000)
    return u.astype(np.uint32).view(np.float32)


def _gauss_window_1d(window_size=WINDOW_SIZE, sigma=1.5):
    coords = np.arange(window_size, dtype=np.float64) - window_size // 2
    g = np.exp(-(coords ** 2) / (2.0 * sigma ** 2))
    return g / g.sum()


def _gauss_taps_bf16(window_size=WINDOW_SIZE, sigma=1.5):
    """Gaussian taps snapped to bf16 values whose sum is still ~1.

    The SSIM conv runs as single-pass bf16 MXU matmuls; snapping the taps to
    bf16 *and* restoring the unit DC gain (<=1 ulp nudges, largest taps first)
    removes the systematic bias this would otherwise introduce into
    sigma12 = E[xy] - mu1*mu2, keeping the loss within ~1e-3 of the f32 ref.
    """
    g = _gauss_window_1d(window_size, sigma)
    gb = _round_to_bf16(g).astype(np.float64)
    for idx in np.argsort(-g):
        gb[idx] = float(_round_to_bf16(gb[idx] + (1.0 - gb.sum()))[0])
    return gb.astype(np.float32)


def _band_matrix(n, g):
    """(n, n) banded matrix implementing a zero-padded 'same' 1-D conv with taps g."""
    half = len(g) // 2
    K = np.zeros((n, n), dtype=np.float32)
    for i in range(n):
        for r in range(max(0, i - half), min(n, i + half + 1)):
            K[i, r] = g[r - i + half]
    return K


@functools.lru_cache(maxsize=None)
def _gauss_band_constants(H, W):
    g = _gauss_taps_bf16()
    return _band_matrix(H, g), _band_matrix(W, g)


# --------------------------------- kernel -------------------------------------
def _loss_block_kernel(x_ref, y_ref, kh_ref, kw_ref, out_ref, *, val_range):
    """Processes PT whole (H, W) planes per grid step.

    x_ref / y_ref : (PT, H, W) raw (unclamped) planes, native dtype.
    kh_ref        : (H, H) bf16 banded Gaussian (H-stage 'same' conv).
    kw_ref        : (W, W) bf16 banded Gaussian (W-stage 'same' conv).
    out_ref       : (1, 8, 128) f32 lane-dense slab; row 0 lanes 0..3 hold
                    [l1_sum, ssim_sum, tv_h_sum, tv_v_sum] for this step.
    """
    PT, H, W = x_ref.shape
    R = PT * H

    x3 = x_ref[...].astype(jnp.float32)
    y3 = y_ref[...].astype(jnp.float32)

    # ---- L1 partial sum (unclamped values, like nn.L1Loss) ----
    l1_sum = jnp.sum(jnp.abs(x3 - y3))

    # ---- Total-variation partial sums (`output` only) ----
    # Full-shape rolls (XLU) + wrap-pair correction instead of (W-1)/(H-1)
    # masked slices.  The correction is direction-agnostic, so it does not
    # depend on the rotate's sign convention.
    x2 = x3.reshape(R, W)

    xw = pltpu.roll(x2, shift=1, axis=1)          # lane rotate
    tv_h = (jnp.sum(jnp.abs(xw - x2))
            - jnp.sum(jnp.abs(x2[:, :1] - x2[:, W - 1:])))

    xs = pltpu.roll(x2, shift=1, axis=0)          # sublane rotate
    first = x3[:, :1, :]                          # (PT, 1, W) first row per plane
    last = x3[:, H - 1:, :]                       # (PT, 1, W) last row per plane
    if PT > 1:
        first_next = jnp.concatenate([first[1:], first[:1]], axis=0)
    else:
        first_next = first
    tv_v = (jnp.sum(jnp.abs(xs - x2))
            - jnp.sum(jnp.abs(last - first_next)))

    # ---- SSIM (on clamped values) ----
    vr = val_range
    xc = jnp.clip(x3, 0.0, vr)
    yc = jnp.clip(y3, 0.0, vr)

    # 5 conv operands stacked along sublanes: a single plain (5R, W) @ (W, W)
    # bf16 matmul does the W-stage 'same' conv for all of them.  The band
    # truncation at the matrix edges reproduces the zero 'same' padding of
    # F.conv2d(padding=5).
    ops = jnp.concatenate([xc, yc, xc * xc, yc * yc, xc * yc], axis=0)  # (5PT,H,W)
    S = ops.reshape(_FIVE * R, W).astype(jnp.bfloat16)
    T = jnp.dot(S, kw_ref[...], preferred_element_type=jnp.float32)     # (5R, W)

    # H-stage: per-plane (H, H) @ (H, W) batched matmul; the plane axis is the
    # batch dim, so there is no block-diagonal redundancy and no transposes.
    T3 = T.reshape(_FIVE * PT, H, W).astype(jnp.bfloat16)
    Kb = jnp.broadcast_to(kh_ref[...][None], (_FIVE * PT, H, H))
    U = jnp.einsum("pij,pjw->piw", Kb, T3,
                   preferred_element_type=jnp.float32)                  # (5PT,H,W)

    mu1 = U[0:PT]
    mu2 = U[PT:2 * PT]
    ex2 = U[2 * PT:3 * PT]
    ey2 = U[3 * PT:4 * PT]
    exy = U[4 * PT:5 * PT]

    mu1_sq = mu1 * mu1
    mu2_sq = mu2 * mu2
    mu1_mu2 = mu1 * mu2
    sigma1_sq = ex2 - mu1_sq
    sigma2_sq = ey2 - mu2_sq
    sigma12 = exy - mu1_mu2

    C1 = (0.01 * vr) ** 2
    C2 = (0.03 * vr) ** 2
    num = (2.0 * mu1_mu2 + C1) * (2.0 * sigma12 + C2)
    den = (mu1_sq + mu2_sq + C1) * (sigma1_sq + sigma2_sq + C2)
    ssim_sum = jnp.sum(num * pl.reciprocal(den, approx=True))

    # ---- Lane-dense (8, 128) output slab; partials in row 0, lanes 0..3 ----
    sub = lax.broadcasted_iota(jnp.int32, (8, 128), 0)
    lane = lax.broadcasted_iota(jnp.int32, (8, 128), 1)
    row0 = sub == 0
    vals = (jnp.where(row0 & (lane == 0), l1_sum, 0.0)
            + jnp.where(row0 & (lane == 1), ssim_sum, 0.0)
            + jnp.where(row0 & (lane == 2), tv_h, 0.0)
            + jnp.where(row0 & (lane == 3), tv_v, 0.0))
    out_ref[0] = vals


# ------------------------------ tiling policy ---------------------------------
def _vmem_capacity_bytes():
    try:
        return int(pltpu.get_tpu_info().vmem_capacity_bytes)
    except Exception:
        return 64 * 1024 * 1024      # conservative: v7x has 64 MiB per TensorCore


def _pick_plane_tile(P, H, W, in_itemsize, budget):
    """Largest divisor of P whose footprint fits `budget`, preferring >= 2 grid
    steps so the x/y DMA of step i+1 overlaps compute of step i and (on v7x)
    both TensorCores get work."""
    def footprint(d):
        f32_plane = d * H * W * 4
        live = 30 * f32_plane                         # f32/bf16 intermediates (generous)
        live += _FIVE * d * H * H * 2                 # broadcast K_H for batched H-stage
        live += 2 * (2 * d * H * W * in_itemsize)     # x & y blocks, double-buffered
        live += 2 * 2 * (H * H + W * W) * 2           # K_H / K_W (bf16), double-buffered
        live += 2 * 8 * 128 * 4                       # output slab, double-buffered
        return live

    divs = [d for d in range(1, P + 1) if P % d == 0 and footprint(d) <= budget]
    if not divs:
        return 1
    pref = [d for d in divs if P // d >= 2]
    return max(pref) if pref else max(divs)


# -------------------------------- wrapper --------------------------------------
def loss_function_pallas(output, target, c=0.5, val_range=1.0):
    # NOTE: `c` is unused in the reference forward (loss weights are hardcoded).
    B, C, H, W = output.shape
    P = B * C

    vmem_cap = _vmem_capacity_bytes()
    vmem_limit = min(int(vmem_cap * 0.7), vmem_cap - (8 << 20))
    PT = _pick_plane_tile(P, H, W, output.dtype.itemsize, int(vmem_limit * 0.85))
    G = P // PT

    # Inputs stay in their native dtype (no wrapper-side f32 cast, no padding);
    # the kernel upcasts after the DMA.
    x = output.reshape(P, H, W)
    y = target.reshape(P, H, W)

    K_H, K_W = _gauss_band_constants(H, W)
    kh = jnp.asarray(K_H, dtype=jnp.bfloat16)   # exact cast: entries are bf16 values
    kw = jnp.asarray(K_W, dtype=jnp.bfloat16)

    kernel = functools.partial(_loss_block_kernel, val_range=float(val_range))

    partials = pl.pallas_call(
        kernel,
        out_shape=jax.ShapeDtypeStruct((G, 8, 128), jnp.float32),
        grid_spec=pltpu.PrefetchScalarGridSpec(
            num_scalar_prefetch=0,
            grid=(G,),
            in_specs=[
                pl.BlockSpec((PT, H, W), lambda g: (g, 0, 0)),
                pl.BlockSpec((PT, H, W), lambda g: (g, 0, 0)),
                pl.BlockSpec((H, H), lambda g: (0, 0)),
                pl.BlockSpec((W, W), lambda g: (0, 0)),
            ],
            out_specs=pl.BlockSpec((1, 8, 128), lambda g: (g, 0, 0)),
        ),
        compiler_params=pltpu.CompilerParams(
            dimension_semantics=("parallel",),
            vmem_limit_bytes=int(vmem_limit)),
    )(x, y, kh, kw)

    l1_sum = jnp.sum(partials[:, 0, 0])
    ssim_sum = jnp.sum(partials[:, 0, 1])
    tvh_sum = jnp.sum(partials[:, 0, 2])
    tvv_sum = jnp.sum(partials[:, 0, 3])

    L1 = l1_sum / (B * C * H * W)
    # per-channel ssim mean is over (B, 1, H, W); Lssim = sum_c (1 - mean_c)
    Lssim = C - ssim_sum / (B * H * W)
    Ltv = tvh_sum / (B * C * H * (W - 1)) + tvv_sum / (B * C * (H - 1) * W)

    return 10.0 * L1 + 1.0 * Lssim + 10.0 * Ltv


# ---------------- pure-JAX reference (for verification only) ----------------
def _loss_function_ref(output, target, val_range=1.0):
    output = output.astype(jnp.float32)
    target = target.astype(jnp.float32)
    B, C, H, W = output.shape
    L1 = jnp.mean(jnp.abs(output - target))

    g = jnp.asarray(_gauss_window_1d(), dtype=jnp.float32)
    win2d = jnp.outer(g, g)[None, None]  # (1,1,11,11) OIHW

    def conv(img):  # img: (B,1,H,W)
        return lax.conv_general_dilated(
            img, win2d, window_strides=(1, 1), padding=[(PAD, PAD), (PAD, PAD)],
            dimension_numbers=("NCHW", "OIHW", "NCHW"),
            precision=lax.Precision.HIGHEST)

    C1 = (0.01 * val_range) ** 2
    C2 = (0.03 * val_range) ** 2
    Lssim = 0.0
    for ch in range(C):
        i1 = jnp.clip(output[:, ch:ch + 1], 0.0, val_range)
        i2 = jnp.clip(target[:, ch:ch + 1], 0.0, val_range)
        mu1, mu2 = conv(i1), conv(i2)
        mu1_sq, mu2_sq, mu1_mu2 = mu1 * mu1, mu2 * mu2, mu1 * mu2
        s1 = conv(i1 * i1) - mu1_sq
        s2 = conv(i2 * i2) - mu2_sq
        s12 = conv(i1 * i2) - mu1_mu2
        smap = ((2 * mu1_mu2 + C1) * (2 * s12 + C2)) / (
            (mu1_sq + mu2_sq + C1) * (s1 + s2 + C2))
        Lssim += 1.0 - jnp.mean(smap)

    tv = (jnp.mean(jnp.abs(output[:, :, :, :-1] - output[:, :, :, 1:]))
          + jnp.mean(jnp.abs(output[:, :, 1:, :] - output[:, :, :-1, :])))
    return 10.0 * L1 + 1.0 * Lssim + 10.0 * tv


if __name__ == "__main__":
    key = jax.random.PRNGKey(0)
    k1, k2 = jax.random.split(key)
    B, C, H, W = 2, 3, 16, 16
    output = jax.random.uniform(k1, (B, C, H, W), dtype=jnp.float32)
    target = jax.random.uniform(k2, (B, C, H, W), dtype=jnp.float32)

    loss = jax.block_until_ready(
        loss_function_pallas(output, target, c=0.5, val_range=1.0))
    ref = jax.block_until_ready(_loss_function_ref(output, target, val_range=1.0))

    assert np.allclose(np.asarray(loss), np.asarray(ref), rtol=5e-3, atol=5e-3), \
        f"mismatch: pallas={loss} ref={ref}"
    print("KERNEL_OK")
</pallas_src>

<mosaic_0001>
module attributes {stable_mosaic.version = 11 : i64} {
  func.func @_loss_block_kernel(%arg0: i32, %arg1: memref<3x16x16xf32, #tpu.memory_space<vmem>>, %arg2: memref<3x16x16xf32, #tpu.memory_space<vmem>>, %arg3: memref<16x16xbf16, #tpu.memory_space<vmem>>, %arg4: memref<16x16xbf16, #tpu.memory_space<vmem>>, %arg5: memref<1x8x128xf32, #tpu.memory_space<vmem>>) attributes {dimension_semantics = [#tpu.dimension_semantics<parallel>], iteration_bounds = array<i64: 2>, scalar_prefetch = 0 : i64, scratch_operands = 0 : i64, tpu.core_type = #tpu.core_type<tc>, window_params = [{transform_indices = @transform_0, window_bounds = array<i64: 3, 16, 16>}, {transform_indices = @transform_1, window_bounds = array<i64: 3, 16, 16>}, {pipeline_mode = #tpu.pipeline_mode<synchronous>, transform_indices = @transform_2, window_bounds = array<i64: 16, 16>}, {pipeline_mode = #tpu.pipeline_mode<synchronous>, transform_indices = @transform_3, window_bounds = array<i64: 16, 16>}, {transform_indices = @transform_4, window_bounds = array<i64: 1, 8, 128>}]} {
    %c0 = arith.constant 0 : index
    %c0_0 = arith.constant 0 : index
    %c0_1 = arith.constant 0 : index
    %0 = vector.load %arg1[%c0, %c0_0, %c0_1] : memref<3x16x16xf32, #tpu.memory_space<vmem>>, vector<3x16x16xf32>
    %c0_2 = arith.constant 0 : index
    %c0_3 = arith.constant 0 : index
    %c0_4 = arith.constant 0 : index
    %1 = vector.load %arg2[%c0_2, %c0_3, %c0_4] : memref<3x16x16xf32, #tpu.memory_space<vmem>>, vector<3x16x16xf32>
    %2 = arith.subf %0, %1 : vector<3x16x16xf32>
    %3 = math.absf %2 : vector<3x16x16xf32>
    %4 = vector.shape_cast %3 : vector<3x16x16xf32> to vector<1x3x16x16xf32>
    %cst = arith.constant dense<0.000000e+00> : vector<1xf32>
    %5 = vector.multi_reduction <add>, %4, %cst [1, 2, 3] : vector<1x3x16x16xf32> to vector<1xf32>
    %6 = vector.shape_cast %5 : vector<1xf32> to vector<1x1x1x1xf32>
    %7 = vector.extract %6[0, 0, 0, 0] : f32 from vector<1x1x1x1xf32>
    %8 = vector.shape_cast %0 : vector<3x16x16xf32> to vector<48x16xf32>
    %c1_i32 = arith.constant 1 : i32
    %9 = tpu.dynamic_rotate %8 by %c1_i32 dim 1 : vector<48x16xf32>, i32 -> vector<48x16xf32>
    %10 = arith.subf %9, %8 : vector<48x16xf32>
    %11 = math.absf %10 : vector<48x16xf32>
    %12 = vector.shape_cast %11 : vector<48x16xf32> to vector<1x48x16xf32>
    %cst_5 = arith.constant dense<0.000000e+00> : vector<1xf32>
    %13 = vector.multi_reduction <add>, %12, %cst_5 [1, 2] : vector<1x48x16xf32> to vector<1xf32>
    %14 = vector.shape_cast %13 : vector<1xf32> to vector<1x1x1xf32>
    %15 = vector.extract %14[0, 0, 0] : f32 from vector<1x1x1xf32>
    %16 = vector.extract_strided_slice %8 {offsets = [0, 0], sizes = [48, 1], strides = [1, 1]} : vector<48x16xf32> to vector<48x1xf32>
    %17 = vector.extract_strided_slice %8 {offsets = [0, 15], sizes = [48, 1], strides = [1, 1]} : vector<48x16xf32> to vector<48x1xf32>
    %18 = arith.subf %16, %17 : vector<48x1xf32>
    %19 = math.absf %18 : vector<48x1xf32>
    %20 = vector.shape_cast %19 : vector<48x1xf32> to vector<1x48x1xf32>
    %cst_6 = arith.constant dense<0.000000e+00> : vector<1xf32>
    %21 = vector.multi_reduction <add>, %20, %cst_6 [1, 2] : vector<1x48x1xf32> to vector<1xf32>
    %22 = vector.shape_cast %21 : vector<1xf32> to vector<1x1x1xf32>
    %23 = vector.extract %22[0, 0, 0] : f32 from vector<1x1x1xf32>
    %24 = arith.subf %15, %23 : f32
    %c1_i32_7 = arith.constant 1 : i32
    %25 = tpu.dynamic_rotate %8 by %c1_i32_7 dim 0 : vector<48x16xf32>, i32 -> vector<48x16xf32>
    %26 = vector.extract_strided_slice %0 {offsets = [0, 0, 0], sizes = [3, 1, 16], strides = [1, 1, 1]} : vector<3x16x16xf32> to vector<3x1x16xf32>
    %27 = vector.extract_strided_slice %0 {offsets = [0, 15, 0], sizes = [3, 1, 16], strides = [1, 1, 1]} : vector<3x16x16xf32> to vector<3x1x16xf32>
    %28 = vector.extract_strided_slice %26 {offsets = [1, 0, 0], sizes = [2, 1, 16], strides = [1, 1, 1]} : vector<3x1x16xf32> to vector<2x1x16xf32>
    %29 = vector.extract_strided_slice %26 {offsets = [0, 0, 0], sizes = [1, 1, 16], strides = [1, 1, 1]} : vector<3x1x16xf32> to vector<1x1x16xf32>
    %30 = tpu.concatenate %28, %29 in 0 : vector<2x1x16xf32>, vector<1x1x16xf32> -> vector<3x1x16xf32>
    %31 = arith.subf %25, %8 : vector<48x16xf32>
    %32 = math.absf %31 : vector<48x16xf32>
    %33 = vector.shape_cast %32 : vector<48x16xf32> to vector<1x48x16xf32>
    %cst_8 = arith.constant dense<0.000000e+00> : vector<1xf32>
    %34 = vector.multi_reduction <add>, %33, %cst_8 [1, 2] : vector<1x48x16xf32> to vector<1xf32>
    %35 = vector.shape_cast %34 : vector<1xf32> to vector<1x1x1xf32>
    %36 = vector.extract %35[0, 0, 0] : f32 from vector<1x1x1xf32>
    %37 = arith.subf %27, %30 : vector<3x1x16xf32>
    %38 = math.absf %37 : vector<3x1x16xf32>
    %39 = vector.shape_cast %38 : vector<3x1x16xf32> to vector<1x3x1x16xf32>
    %cst_9 = arith.constant dense<0.000000e+00> : vector<1xf32>
    %40 = vector.multi_reduction <add>, %39, %cst_9 [1, 2, 3] : vector<1x3x1x16xf32> to vector<1xf32>
    %41 = vector.shape_cast %40 : vector<1xf32> to vector<1x1x1x1xf32>
    %42 = vector.extract %41[0, 0, 0, 0] : f32 from vector<1x1x1x1xf32>
    %43 = arith.subf %36, %42 : f32
    %cst_10 = arith.constant 0.000000e+00 : f32
    %cst_11 = arith.constant 1.000000e+00 : f32
    %44 = vector.broadcast %cst_10 : f32 to vector<3x16x16xf32>
    %45 = arith.maximumf %44, %0 : vector<3x16x16xf32>
    %46 = vector.broadcast %cst_11 : f32 to vector<3x16x16xf32>
    %47 = arith.minimumf %46, %45 : vector<3x16x16xf32>
    %cst_12 = arith.constant 0.000000e+00 : f32
    %cst_13 = arith.constant 1.000000e+00 : f32
    %48 = vector.broadcast %cst_12 : f32 to vector<3x16x16xf32>
    %49 = arith.maximumf %48, %1 : vector<3x16x16xf32>
    %50 = vector.broadcast %cst_13 : f32 to vector<3x16x16xf32>
    %51 = arith.minimumf %50, %49 : vector<3x16x16xf32>
    %52 = arith.mulf %47, %47 : vector<3x16x16xf32>
    %53 = arith.mulf %51, %51 : vector<3x16x16xf32>
    %54 = arith.mulf %47, %51 : vector<3x16x16xf32>
    %55 = tpu.concatenate %47, %51, %52, %53, %54 in 0 : vector<3x16x16xf32>, vector<3x16x16xf32>, vector<3x16x16xf32>, vector<3x16x16xf32>, vector<3x16x16xf32> -> vector<15x16x16xf32>
    %56 = vector.shape_cast %55 : vector<15x16x16xf32> to vector<240x16xf32>
    %57 = arith.truncf %56 : vector<240x16xf32> to vector<240x16xbf16>
    %c0_14 = arith.constant 0 : index
    %c0_15 = arith.constant 0 : index
    %58 = vector.load %arg4[%c0_14, %c0_15] : memref<16x16xbf16, #tpu.memory_space<vmem>>, vector<16x16xbf16>
    %cst_16 = arith.constant dense<0.000000e+00> : vector<240x16xf32>
    %59 = tpu.matmul %57, %58, %cst_16 {dimension_numbers = #tpu.dot_dimension_numbers<[1], [0], [0], [1], [0, 0, 1, 1], [], []>} : vector<240x16xbf16>, vector<16x16xbf16>, vector<240x16xf32> -> vector<240x16xf32>
    %60 = vector.shape_cast %59 : vector<240x16xf32> to vector<15x16x16xf32>
    %61 = arith.truncf %60 : vector<15x16x16xf32> to vector<15x16x16xbf16>
    %c0_17 = arith.constant 0 : index
    %c0_18 = arith.constant 0 : index
    %62 = vector.load %arg3[%c0_17, %c0_18] : memref<16x16xbf16, #tpu.memory_space<vmem>>, vector<16x16xbf16>
    %63 = vector.shape_cast %62 : vector<16x16xbf16> to vector<1x16x16xbf16>
    %64 = vector.shape_cast %63 : vector<1x16x16xbf16> to vector<1x16x16xbf16>
    %65 = vector.broadcast %64 : vector<1x16x16xbf16> to vector<15x16x16xbf16>
    "tpu.trace_start"() <{level = 10 : i32, message = "pij,pjw->piw"}> : () -> ()
    %cst_19 = arith.constant dense<0.000000e+00> : vector<15x16x16xf32>
    %66 = tpu.matmul %65, %61, %cst_19 {dimension_numbers = #tpu.dot_dimension_numbers<[2], [1], [1], [2], [0, 0, 0, 1, 1, 2], [0], [0]>} : vector<15x16x16xbf16>, vector<15x16x16xbf16>, vector<15x16x16xf32> -> vector<15x16x16xf32>
    "tpu.trace_stop"() : () -> ()
    %67 = vector.extract_strided_slice %66 {offsets = [0, 0, 0], sizes = [3, 16, 16], strides = [1, 1, 1]} : vector<15x16x16xf32> to vector<3x16x16xf32>
    %68 = vector.extract_strided_slice %66 {offsets = [3, 0, 0], sizes = [3, 16, 16], strides = [1, 1, 1]} : vector<15x16x16xf32> to vector<3x16x16xf32>
    %69 = vector.extract_strided_slice %66 {offsets = [6, 0, 0], sizes = [3, 16, 16], strides = [1, 1, 1]} : vector<15x16x16xf32> to vector<3x16x16xf32>
    %70 = vector.extract_strided_slice %66 {offsets = [9, 0, 0], sizes = [3, 16, 16], strides = [1, 1, 1]} : vector<15x16x16xf32> to vector<3x16x16xf32>
    %71 = vector.extract_strided_slice %66 {offsets = [12, 0, 0], sizes = [3, 16, 16], strides = [1, 1, 1]} : vector<15x16x16xf32> to vector<3x16x16xf32>
    %72 = arith.mulf %67, %67 : vector<3x16x16xf32>
    %73 = arith.mulf %68, %68 : vector<3x16x16xf32>
    %74 = arith.mulf %67, %68 : vector<3x16x16xf32>
    %75 = arith.subf %69, %72 : vector<3x16x16xf32>
    %76 = arith.subf %70, %73 : vector<3x16x16xf32>
    %77 = arith.subf %71, %74 : vector<3x16x16xf32>
    %cst_20 = arith.constant 2.000000e+00 : f32
    %78 = vector.broadcast %cst_20 : f32 to vector<3x16x16xf32>
    %79 = arith.mulf %78, %74 : vector<3x16x16xf32>
    %cst_21 = arith.constant 9.99999974E-5 : f32
    %80 = vector.broadcast %cst_21 : f32 to vector<3x16x16xf32>
    %81 = arith.addf %79, %80 : vector<3x16x16xf32>
    %cst_22 = arith.constant 2.000000e+00 : f32
    %82 = vector.broadcast %cst_22 : f32 to vector<3x16x16xf32>
    %83 = arith.mulf %82, %77 : vector<3x16x16xf32>
    %cst_23 = arith.constant 8.99999984E-4 : f32
    %84 = vector.broadcast %cst_23 : f32 to vector<3x16x16xf32>
    %85 = arith.addf %83, %84 : vector<3x16x16xf32>
    %86 = arith.mulf %81, %85 : vector<3x16x16xf32>
    %87 = arith.addf %72, %73 : vector<3x16x16xf32>
    %cst_24 = arith.constant 9.99999974E-5 : f32
    %88 = vector.broadcast %cst_24 : f32 to vector<3x16x16xf32>
    %89 = arith.addf %87, %88 : vector<3x16x16xf32>
    %90 = arith.addf %75, %76 : vector<3x16x16xf32>
    %cst_25 = arith.constant 8.99999984E-4 : f32
    %91 = vector.broadcast %cst_25 : f32 to vector<3x16x16xf32>
    %92 = arith.addf %90, %91 : vector<3x16x16xf32>
    %93 = arith.mulf %89, %92 : vector<3x16x16xf32>
    %94 = tpu.reciprocal %93 {approx = true} : vector<3x16x16xf32> -> vector<3x16x16xf32>
    %95 = arith.mulf %86, %94 : vector<3x16x16xf32>
    %96 = vector.shape_cast %95 : vector<3x16x16xf32> to vector<1x3x16x16xf32>
    %cst_26 = arith.constant dense<0.000000e+00> : vector<1xf32>
    %97 = vector.multi_reduction <add>, %96, %cst_26 [1, 2, 3] : vector<1x3x16x16xf32> to vector<1xf32>
    %98 = vector.shape_cast %97 : vector<1xf32> to vector<1x1x1x1xf32>
    %99 = vector.extract %98[0, 0, 0, 0] : f32 from vector<1x1x1x1xf32>
    %100 = tpu.iota {dimensions = array<i32: 0>} : vector<8x128xi32>
    %101 = tpu.iota {dimensions = array<i32: 1>} : vector<8x128xi32>
    %c0_i32 = arith.constant 0 : i32
    %102 = vector.broadcast %c0_i32 : i32 to vector<8x128xi32>
    %103 = arith.cmpi eq, %100, %102 : vector<8x128xi32>
    %c0_i32_27 = arith.constant 0 : i32
    %104 = vector.broadcast %c0_i32_27 : i32 to vector<8x128xi32>
    %105 = arith.cmpi eq, %101, %104 : vector<8x128xi32>
    %106 = arith.andi %103, %105 : vector<8x128xi1>
    %cst_28 = arith.constant 0.000000e+00 : f32
    %107 = vector.broadcast %7 : f32 to vector<8x128xf32>
    %108 = vector.broadcast %cst_28 : f32 to vector<8x128xf32>
    %109 = arith.select %106, %107, %108 : vector<8x128xi1>, vector<8x128xf32>
    %c1_i32_29 = arith.constant 1 : i32
    %110 = vector.broadcast %c1_i32_29 : i32 to vector<8x128xi32>
    %111 = arith.cmpi eq, %101, %110 : vector<8x128xi32>
    %112 = arith.andi %103, %111 : vector<8x128xi1>
    %cst_30 = arith.constant 0.000000e+00 : f32
    %113 = vector.broadcast %99 : f32 to vector<8x128xf32>
    %114 = vector.broadcast %cst_30 : f32 to vector<8x128xf32>
    %115 = arith.select %112, %113, %114 : vector<8x128xi1>, vector<8x128xf32>
    %116 = arith.addf %109, %115 : vector<8x128xf32>
    %c2_i32 = arith.constant 2 : i32
    %117 = vector.broadcast %c2_i32 : i32 to vector<8x128xi32>
    %118 = arith.cmpi eq, %101, %117 : vector<8x128xi32>
    %119 = arith.andi %103, %118 : vector<8x128xi1>
    %cst_31 = arith.constant 0.000000e+00 : f32
    %120 = vector.broadcast %24 : f32 to vector<8x128xf32>
    %121 = vector.broadcast %cst_31 : f32 to vector<8x128xf32>
    %122 = arith.select %119, %120, %121 : vector<8x128xi1>, vector<8x128xf32>
    %123 = arith.addf %116, %122 : vector<8x128xf32>
    %c3_i32 = arith.constant 3 : i32
    %124 = vector.broadcast %c3_i32 : i32 to vector<8x128xi32>
    %125 = arith.cmpi eq, %101, %124 : vector<8x128xi32>
    %126 = arith.andi %103, %125 : vector<8x128xi1>
    %cst_32 = arith.constant 0.000000e+00 : f32
    %127 = vector.broadcast %43 : f32 to vector<8x128xf32>
    %128 = vector.broadcast %cst_32 : f32 to vector<8x128xf32>
    %129 = arith.select %126, %127, %128 : vector<8x128xi1>, vector<8x128xf32>
    %130 = arith.addf %123, %129 : vector<8x128xf32>
    %c0_33 = arith.constant 0 : index
    %c0_34 = arith.constant 0 : index
    %c0_35 = arith.constant 0 : index
    %131 = vector.load %arg5[%c0_33, %c0_34, %c0_35] : memref<1x8x128xf32, #tpu.memory_space<vmem>>, vector<1x8x128xf32>
    %132 = vector.shape_cast %131 : vector<1x8x128xf32> to vector<8x128xf32>
    %133 = vector.shape_cast %130 : vector<8x128xf32> to vector<1x8x128xf32>
    tpu.vector_store %arg5[%c0_33, %c0_34, %c0_35], %133 {strides = array<i32>} : memref<1x8x128xf32, #tpu.memory_space<vmem>>, vector<1x8x128xf32>,
    return
  }
  func.func @transform_0(%arg0: i32) -> (i32, i32, i32) {
    %c0_i32 = arith.constant 0 : i32
    %c0_i32_0 = arith.constant 0 : i32
    %c0_i32_1 = arith.constant 0 : i32
    return %arg0, %c0_i32, %c0_i32_0 : i32, i32, i32
  }
  func.func @transform_1(%arg0: i32) -> (i32, i32, i32) {
    %c0_i32 = arith.constant 0 : i32
    %c0_i32_0 = arith.constant 0 : i32
    %c0_i32_1 = arith.constant 0 : i32
    return %arg0, %c0_i32, %c0_i32_0 : i32, i32, i32
  }
  func.func @transform_2(%arg0: i32) -> (i32, i32) {
    %c0_i32 = arith.constant 0 : i32
    %c0_i32_0 = arith.constant 0 : i32
    %c0_i32_1 = arith.constant 0 : i32
    return %c0_i32, %c0_i32_0 : i32, i32
  }
  func.func @transform_3(%arg0: i32) -> (i32, i32) {
    %c0_i32 = arith.constant 0 : i32
    %c0_i32_0 = arith.constant 0 : i32
    %c0_i32_1 = arith.constant 0 : i32
    return %c0_i32, %c0_i32_0 : i32, i32
  }
  func.func @transform_4(%arg0: i32) -> (i32, i32, i32) {
    %c0_i32 = arith.constant 0 : i32
    %c0_i32_0 = arith.constant 0 : i32
    %c0_i32_1 = arith.constant 0 : i32
    return %arg0, %c0_i32, %c0_i32_0 : i32, i32, i32
  }
}

</mosaic_0001>

<bundles_post_ra>
// kernel: tpu_custom_call.1
= control target key start
LH: loop header
LB: loop body
LE: loop exit
PB: predicated region body
PF: predicated region fallthrough
CT: control target
= control target key end

     0   :  { %s2964_s0 = inlined_call_operand.hbm [shape: f32[6,16,16], index: 0, kind: input, shape index: {}]   ;;  %s2965_s1 = inlined_call_operand.hbm [shape: f32[6,16,16], index: 1, kind: input, shape index: {}]   ;;  %s2966_s2 = inlined_call_operand.hbm [shape: bf16[16,16], index: 2, kind: input, shape index: {}]   ;;  %s2967_s3 = inlined_call_operand.hbm [shape: bf16[16,16], index: 3, kind: input, shape index: {}]   ;;  %s2968_s4 = inlined_call_operand.hbm [shape: f32[2,8,128], index: 4, kind: output, shape index: {}]  }
   0x1   :  { %2972 = sst [smem:[#allocation16_spill]] %s2964_s0 }
   0x2   :  { %9 = vsyncpa [#allocation3], 0 }
   0x3   :  { %11 = vsyncpa [#allocation3 + $0x1], 0 }
   0x4   :  { %12 = vsyncpa [#allocation6], 0 }
   0x5   :  { %14 = vsyncpa [#allocation6 + $0x1], 0 }
   0x6   :  { %15 = vsyncpa [#allocation9], 0 }
   0x7   :  { %16 = vsyncpa [#allocation4], 0 }
   0x8   :  { %18 = vsyncpa [#allocation4 + $0x1], 0  ;;  %s2356_s15 = smov 0   ;;  %s2358_s16 = smov 0  }
   0x9   :  { %s2360_s17 = smov 0   ;;  %s2362_s18 = smov 0  }
   0xa LB: > { %s2377_s19 = sadd.s32 4294967295, %s2315_s18   ;;  %s1768_s20 = sadd.s32 4294967294, %s2315_s18   ;;  %s2315_s18 = sphi %s2362_s18, %s2992_s18   ;;  %s2311_s17 = sphi %s2360_s17, %s2991_s17   ;;  %s2307_s16 = sphi %s2358_s16, %s2990_s16   ;;  %s2303_s15 = sphi %s2356_s15, %s2989_s15  }
   0xb   : > { %p44_p0 = scmp.ne.s32.totalorder %s2307_s16, %s2303_s15  ;;  %p2969_p1 = scmp.eq.s32.totalorder %s2377_s19, 0 }
   0xc   : > { %p142_p3 = scmp.eq.s32.totalorder %s1768_s20, 1  ;;  %p1769_p5 = scmp.ge.s32.totalorder %s2315_s18, 1 }
   0xd   : > { %p2386_p4 = por %p2969_p1, %p44_p0  ;;  %p149_p7 = scmp.lt.s32.totalorder %s2315_s18, 3 }
   0xe   : > { %p2391_p6 = por %p142_p3, %p44_p0  ;;  %s2317_s24 = smov [#allocation7]  }
   0xf   : > { %s2973_s21 = scalar_select %p2386_p4, 1, 0 }
  0x10   : > { %s2974_s22 = scalar_select %p2391_p6, 1, 0 }
  0x11   : > { %p2396_p8 = pnand %p1769_p5, %p149_p7  ;;  %s161_s25 = sshll.u32 %s2317_s24, 4  ;;  %s162_s25 = int_to_ptr.vmem [resolvable:$true] %s161_s25 }
  0x12   : > { %s2318_s27 = smov [#allocation8]   ;;  %s2142_s29 = scalar_lea.vmem %s162_s25, 128 }
  0x13   : > { %p2050_p9 = pneg %p2396_p8  ;;  %s174_s28 = sshll.u32 %s2318_s27, 4  ;;  %s175_s28 = int_to_ptr.vmem [resolvable:$true] %s174_s28 }
  0x14   : > { %p2143_p13 = scmp.ne.s32.totalorder %s162_s25, %s2142_s29  ;;  %p2150_p5 = scmp.lt.s32.totalorder %s162_s25, %s162_s25 }
  0x15   : > { %p2405_p11 = pnand %p2050_p9, %p2969_p1  ;;  %p2151_p7 = scmp.lt.s32.totalorder %s2142_s29, %s2142_s29 }
  0x17   : > { %p2133_p12 = pneg %p2405_p11  ;;  %p2152_p10 = por %p2151_p7, %p2150_p5 }
  0x19   : > { %p2145_p0 = pnand %p2143_p13, %p2133_p12 }
  0x1b   : > { %p2146_p3 = pneg %p2145_p0 }
  0x1d   : > { %p2153_p9 = pnand %p2152_p10, %p2146_p3 }
  0x1f   : > { %2156 = shalt.err (!%p2153_p9)
}
  0x20   : > { %s2319_s30 = smov 64   ;;  %s2320_s5 = smov 4  }
  0x21   : > { %2053 = dma.hbm_to_vmem [thread:$0]  (!%p2405_p11), %s2966_s2, 128, %s162_s25, [#allocation6], %s2319_s30, %s2319_s30, %s2320_s5  }
  0x22   : > { %s2168_s8 = scalar_lea.vmem %s175_s28, 128  ;;  %p2176_p2 = scmp.lt.s32.totalorder %s175_s28, %s175_s28 }
  0x23   : > { %p2169_p1 = scmp.ne.s32.totalorder %s175_s28, %s2168_s8  ;;  %p2177_p6 = scmp.lt.s32.totalorder %s2168_s8, %s2168_s8 }
  0x25   : > { %p2171_p13 = pnand %p2169_p1, %p2133_p12  ;;  %p2178_p5 = por %p2177_p6, %p2176_p2 }
  0x27   : > { %p2172_p0 = pneg %p2171_p13 }
  0x29   : > { %p2179_p10 = pnand %p2178_p5, %p2172_p0 }
  0x2b   : > { %2182 = shalt.err (!%p2179_p10)
}
  0x2c   : > { %2056 = dma.hbm_to_vmem [thread:$0]  (!%p2405_p11), %s2967_s3, 128, %s175_s28, [#allocation9], %s2319_s30, %s2319_s30, %s2320_s5  }
  0x2d   : > { %s2428_s11 = sadd.s32 1, %s2315_s18   ;;  %s31_s12 = sadd.s32 1, %s2311_s17 }
  0x2e   : > { %s28_s13 = ssub.s32 %s2315_s18, %s2428_s11  ;;  %p38_p1 = scmp.ne.s32.totalorder %s2311_s17, %s2307_s16 }
  0x2f   : > { %p29_p2 = scmp.eq.s32.totalorder %s28_s13, 0  ;;  %p39_p6 = scmp.eq.s32.totalorder %s2315_s18, 0 }
  0x30   : > { %p2977_p12 = scmp.eq.s32.totalorder %s2377_s19, 1  ;;  %p2070_p7 = scmp.lt.s32.totalorder %s2315_s18, 2 }
  0x31   : > { %s2444_s20 = scalar_select %p29_p2, %s2311_s17, %s31_s12  }
  0x32   : > { %p2438_p3 = por %p2977_p12, %p38_p1  ;;  %p40_p9 = por %p39_p6, %p38_p1 }
  0x33   : > { %s188_s24 = sand.u32 1, %s2311_s17   ;;  %s1821_s26 = smul.u32 768, %s2315_s18 }
  0x34   : > { %s2978_s14 = scalar_select %p2438_p3, 1, 0 }
  0x35   : > { %s2447_s25 = smul.u32 48, %s188_s24  ;;  %p2450_p11 = pnand %p2070_p7, %p40_p9 }
  0x36   : > { %s2980_s0 = sld [smem:[#allocation16_spill]]  ;;  %s210_s7 = sand.u32 1, %s2315_s18  }
  0x37   : > { %s192_s5 = scalar_lea.vmem [#allocation2], %s2447_s25  ;;  %s2465_s8 = scalar_lea.sflag [#allocation3], %s188_s24 }
  0x38   : > { %s200_s6 = sshll.u32 %s192_s5, 4  ;;  %p2185_p0 = pneg %p2450_p11  ;;  %s2462_s6 = int_to_ptr.vmem [resolvable:$true] %s200_s6 }
  0x3c   : > { %s2459_s30 = scalar_lea.hbm %s2980_s0, %s1821_s26  ;;  %s2188_s13 = scalar_lea.hbm %s2980_s0, 1536 }
  0x3d   : > { %s2183_s9 = scalar_lea.hbm %s2459_s30, 768  ;;  %p2189_p1 = scmp.lt.s32.totalorder %s2459_s30, %s2980_s0 }
  0x3e   : > { %p2184_p13 = scmp.ne.s32.totalorder %s2459_s30, %s2183_s9  ;;  %p2190_p2 = scmp.lt.s32.totalorder %s2188_s13, %s2183_s9 }
  0x40   : > { %p2186_p5 = pnand %p2185_p0, %p2184_p13  ;;  %p2191_p6 = por %p2190_p2, %p2189_p1 }
  0x42   : > { %p2187_p10 = pneg %p2186_p5 }
  0x44   : > { %p2192_p12 = pnand %p2191_p6, %p2187_p10 }
  0x46   : > { %2195 = shalt.err (!%p2192_p12)
}
  0x47   : > { %s2196_s24 = scalar_lea.vmem %s2462_s6, 768  ;;  %s2321_s5 = smov [#allocation2]  }
  0x48   : > { %p2197_p7 = scmp.ne.s32.totalorder %s2462_s6, %s2196_s24  ;;  %s2201_s10 = sshll.u32 %s2321_s5, 4  ;;  %s2202_s10 = int_to_ptr.vmem [resolvable:$false] %s2201_s10 }
  0x49   : > { %s2203_s12 = scalar_lea.vmem %s2202_s10, 1536  ;;  %p2204_p5 = scmp.lt.s32.totalorder %s2462_s6, %s2202_s10 }
  0x4a   : > { %p2199_p9 = pnand %p2197_p7, %p2185_p0  ;;  %p2205_p3 = scmp.lt.s32.totalorder %s2203_s12, %s2196_s24 }
  0x4c   : > { %p2200_p13 = pneg %p2199_p9  ;;  %p2206_p4 = por %p2205_p3, %p2204_p5 }
  0x4e   : > { %p2207_p1 = pnand %p2206_p4, %p2200_p13 }
  0x50   : > { %2210 = shalt.err (!%p2207_p1)
}
  0x51   : > { %s2322_s9 = smov 128   ;;  %s2323_s13 = smov 8  }
  0x52   : > { %2060 = dma.hbm_to_vmem [thread:$0]  (!%p2450_p11), %s2459_s30, 768, %s2462_s6, %s2465_s8, %s2322_s9, %s2322_s9, %s2323_s13  }
  0x53   : > { %s2500_s24 = scalar_lea.hbm %s2965_s1, %s1821_s26  ;;  %s214_s5 = scalar_lea.vmem [#allocation5], %s2447_s25 }
  0x54   : > { %s222_s10 = sshll.u32 %s214_s5, 4  ;;  %s211_s12 = scalar_lea.sflag [#allocation6], %s210_s7  ;;  %s2503_s10 = int_to_ptr.vmem [resolvable:$true] %s222_s10 }
  0x55   : > { %s2211_s0 = scalar_lea.hbm %s2500_s24, 768  ;;  %s2216_s26 = scalar_lea.hbm %s2965_s1, 1536 }
  0x56   : > { %p2212_p4 = scmp.ne.s32.totalorder %s2500_s24, %s2211_s0  ;;  %p2217_p2 = scmp.lt.s32.totalorder %s2500_s24, %s2965_s1 }
  0x57   : > { %p2218_p6 = scmp.lt.s32.totalorder %s2216_s26, %s2211_s0 }
  0x58   : > { %p2214_p3 = pnand %p2212_p4, %p2185_p0 }
  0x59   : > { %p2219_p12 = por %p2218_p6, %p2217_p2 }
  0x5a   : > { %p2215_p10 = pneg %p2214_p3 }
  0x5c   : > { %p2220_p7 = pnand %p2219_p12, %p2215_p10 }
  0x5e   : > { %2223 = shalt.err (!%p2220_p7)
}
  0x5f   : > { %s2224_s25 = scalar_lea.vmem %s2503_s10, 768  ;;  %s2324_s7 = smov [#allocation5]  }
  0x60   : > { %p2225_p9 = scmp.ne.s32.totalorder %s2503_s10, %s2224_s25  ;;  %s2229_s29 = sshll.u32 %s2324_s7, 4  ;;  %s2230_s29 = int_to_ptr.vmem [resolvable:$false] %s2229_s29 }
  0x61   : > { %s2231_s5 = scalar_lea.vmem %s2230_s29, 1536  ;;  %p2232_p1 = scmp.lt.s32.totalorder %s2503_s10, %s2230_s29 }
  0x62   : > { %p2227_p13 = pnand %p2225_p9, %p2185_p0  ;;  %p2233_p4 = scmp.lt.s32.totalorder %s2231_s5, %s2224_s25 }
  0x64   : > { %p2228_p5 = pneg %p2227_p13  ;;  %p2234_p3 = por %p2233_p4, %p2232_p1 }
  0x66   : > { %p2235_p2 = pnand %p2234_p3, %p2228_p5 }
  0x68   : > { %2238 = shalt.err (!%p2235_p2)
}
  0x69   : > { %2063 = dma.hbm_to_vmem [thread:$0]  (!%p2450_p11), %s2500_s24, 768, %s2503_s10, %s211_s12, %s2322_s9, %s2322_s9, %s2323_s13  }
  0x6a   : > { %234 = sbr.rel (%p2396_p8) target bundleno = 874 (0x36a), region = 36  ;;  %s2535_s0 = sand.u32 (!%p2396_p8), 1, %s2307_s16  }
  0x6b   : > { %s2023_s30 = smul.u32 (!%p2396_p8), 48, %s2535_s0  ;;  %s237_s6 = scalar_lea.sflag (!%p2396_p8), [#allocation3], %s2535_s0 }
  0x6c   : > { %p2981_p0 = scmp.ne.s32.totalorder (!%p2396_p8), %s2973_s21, 0 }
  0x6d   : > { %s2539_s26 = scalar_lea.vmem (!%p2396_p8), [#allocation2], %s2023_s30 }
  0x6f   : > { %2282 = dma.done.wait (%p2981_p0), %s237_s6, 768  }
  0x70   : > { %2284 = vsyncadd (%p2981_p0), %s237_s6, 4294966528  ;;  %s245_s27 = sand.u32 1, %s2377_s19   ;;  %s2546_s9 = scalar_lea.vmem [#allocation5], %s2023_s30 }
  0x71   : > { %s246_s23 = scalar_lea.sflag [#allocation6], %s245_s27 }
  0x72   : > { %2286 = dma.done.wait (%p2981_p0), %s246_s23, 768  }
  0x73   : > { %2288 = vsyncadd (%p2981_p0), %s246_s23, 4294966528  ;;  %p2982_p8 = scmp.eq.s32.totalorder %s2377_s19, 0 }
  0x75   : > { %2290 = dma.done.wait (%p2982_p8), [#allocation6], 128   ;;  %p2983_p11 = pmov %p2982_p8 }
  0x76   : > { %p2984_p10 = pmov %p2982_p8 }
  0x77   : > { %2292 = vsyncadd (%p2983_p11), [#allocation6], 4294967168 }
  0x78   : > { %2294 = dma.done.wait (%p2984_p10), [#allocation9], 128   ;;  %p2985_p6 = pmov %p2982_p8 }
  0x79   : > { %v2325_v0 = vmov 0.0   ;;  %vm2326_vm0 = vmmov 0   ;;  %v2117_v1 = vld [vmem:[#allocation8] sm:$0xff]   ;;  %v2567_v2 = vld [vmem:[%s2539_s26] sm:$0xff]  ;;  %v2573_v4 = vld [vmem:[%s2539_s26 + $0x10] sm:$0xff]  ;;  %s2327_s21 = smov 16  }
  0x7a   : > { %2296 = vsyncadd (%p2985_p6), [#allocation9], 4294967168  ;;  %1869 = vmatprep.subr.bf16.mxu0 %v2325_v0  ;;  %1871 = vmatprep.mubr.msk.bf16.mxu0 %vm2326_vm0, %v2325_v0  ;;  %v2570_v3 = vld [vmem:[%s2539_s26 + $0x8] sm:$0xff]  ;;  %v588_v5 = vmax.f32 %v2567_v2, 0.0  ;;  %v2578_v7 = vld [vmem:[%s2539_s26 + $0x18] sm:$0xff]  ;;  %v590_v8 = vmax.f32 %v2573_v4, 0.0 }
  0x7b   : > { %1931 = vmatprep.subr.bf16.mxu1 %v2325_v0  ;;  %1933 = vmatprep.mubr.msk.bf16.mxu1 %vm2326_vm0, %v2325_v0  ;;  %v589_v6 = vmax.f32 %v2570_v3, 0.0  ;;  %v591_v11 = vmax.f32 %v2578_v7, 0.0  ;;  %v2587_v12 = vld [vmem:[%s2539_s26 + $0x20] sm:$0xff]  ;;  %v2590_v13 = vld [vmem:[%s2539_s26 + $0x28] sm:$0xff]  ;;  %vm314_vm1 = vcmask 130048   ;;  %v2599_v16 = vld [vmem:[%s2546_s9 + $0x10] sm:$0xff] }
  0x7c   : > { %1870 = vmatpush3.bf16.msra.mxu0 %v2117_v1  ;;  %336 = vrot.lane.b32.xlu0 %v2567_v2, %s2327_s21  ;;  %v594_v9 = vmin.f32 %v588_v5, 1.0  ;;  %v2593_v14 = vld [vmem:[%s2546_s9] sm:$0xff]  ;;  %v2596_v15 = vld [vmem:[%s2546_s9 + $0x8] sm:$0xff]  ;;  %v2602_v17 = vld [vmem:[%s2546_s9 + $0x18] sm:$0xff]  ;;  %v596_v21 = vmin.f32 %v590_v8, 1.0  ;;  %v592_v22 = vmax.f32 %v2587_v12, 0.0 }
  0x7d   : > { %342 = vrot.lane.b32.xlu1 %v2573_v4, %s2327_s21  ;;  %v595_v10 = vmin.f32 %v589_v6, 1.0  ;;  %v2605_v19 = vld [vmem:[%s2546_s9 + $0x20] sm:$0xff]  ;;  %v2608_v20 = vld [vmem:[%s2546_s9 + $0x28] sm:$0xff]  ;;  %v597_v23 = vmin.f32 %v591_v11, 1.0  ;;  %v600_v24 = vmax.f32 %v2593_v14, 0.0  ;;  %v601_v25 = vmax.f32 %v2596_v15, 0.0 }
  0x7e   : > { %v602_v26 = vmax.f32 %v2599_v16, 0.0  ;;  %v593_v27 = vmax.f32 %v2590_v13, 0.0  ;;  %v603_v28 = vmax.f32 %v2602_v17, 0.0  ;;  %v604_v29 = vmax.f32 %v2605_v19, 0.0  ;;  %s2328_s13 = smov 15   ;;  %s2329_s24 = smov 113  }
  0x7f   : > { %v630_v18 = vpack.c.bf16 %v595_v10, %v594_v9  ;;  %v605_v30 = vmax.f32 %v2608_v20, 0.0  ;;  %v598_v31 = vmin.f32 %v592_v22, 1.0  ;;  %v631_v32 = vpack.c.bf16 %v597_v23, %v596_v21  ;;  %s1780_s29 = sshll.u32 %s2535_s0, 3  ;;  %s1814_s6 = sshll.u32 %s2377_s19, 7 }
  0x80   : > { %339 = vrot.lane.b32.xlu0 %v2570_v3, %s2327_s21  ;;  %v606_v33 = vmin.f32 %v600_v24, 1.0  ;;  %v607_v34 = vmin.f32 %v601_v25, 1.0  ;;  %v608_v35 = vmin.f32 %v602_v26, 1.0  ;;  %v599_v36 = vmin.f32 %v593_v27, 1.0  ;;  %s286_s26 = scalar_lea.vmem [#allocation10], %s1780_s29  ;;  %p2986_p7 = scmp.ne.s32.totalorder %s2978_s14, 0 }
  0x81   : > { %345 = vrot.lane.b32.xlu1 %v2578_v7, %s2327_s21  ;;  %1872 = vmatmul.mubr.msk.bf16.vlgmr.msra.gmra.mxu0 %vm314_vm1, %v630_v18  ;;  %v609_v37 = vmin.f32 %v603_v28, 1.0  ;;  %v610_v38 = vmin.f32 %v604_v29, 1.0  ;;  %v611_v39 = vmin.f32 %v605_v30, 1.0  ;;  %v612_v53 = vmul.f32 %v594_v9, %v594_v9  ;;  %s1656_s27 = sshll.u32 %s286_s26, 4  ;;  %s1657_s27 = int_to_ptr.vmem [resolvable:$true] %s1656_s27 }
  0x82   : > { %1875 = vmatprep.mubr.msk.bf16.mxu0 %vm2326_vm0, %v2325_v0  ;;  %v624_v40 = vmul.f32 %v606_v33, %v594_v9  ;;  %v625_v41 = vmul.f32 %v607_v34, %v595_v10  ;;  %v626_v42 = vmul.f32 %v608_v35, %v596_v21  ;;  %v632_v49 = vpack.c.bf16 %v599_v36, %v598_v31 }
  0x83   : > { %v627_v43 = vmul.f32 %v609_v37, %v597_v23  ;;  %v628_v44 = vmul.f32 %v610_v38, %v598_v31  ;;  %v629_v45 = vmul.f32 %v611_v39, %v599_v36  ;;  %v633_v50 = vpack.c.bf16 %v607_v34, %v606_v33 }
  0x84   : > { %348 = vrot.lane.b32.xlu0 %v2587_v12, %s2327_s21  ;;  %v642_v46 = vpack.c.bf16 %v625_v41, %v624_v40  ;;  %v634_v51 = vpack.c.bf16 %v609_v37, %v608_v35  ;;  %v635_v52 = vpack.c.bf16 %v611_v39, %v610_v38  ;;  %v613_v54 = vmul.f32 %v595_v10, %v595_v10 }
  0x85   : > { %351 = vrot.lane.b32.xlu1 %v2590_v13, %s2327_s21  ;;  %v643_v47 = vpack.c.bf16 %v627_v43, %v626_v42  ;;  %v644_v48 = vpack.c.bf16 %v629_v45, %v628_v44  ;;  %v614_v56 = vmul.f32 %v596_v21, %v596_v21  ;;  %v615_v57 = vmul.f32 %v597_v23, %v597_v23 }
  0x86   : > { %v636_v55 = vpack.c.bf16 %v613_v54, %v612_v53  ;;  %v616_v59 = vmul.f32 %v598_v31, %v598_v31  ;;  %v617_v60 = vmul.f32 %v599_v36, %v599_v36  ;;  %v618_v62 = vmul.f32 %v606_v33, %v606_v33 }
  0x87   : > { %v637_v58 = vpack.c.bf16 %v615_v57, %v614_v56  ;;  %v619_v63 = vmul.f32 %v607_v34, %v607_v34  ;;  %v620_v5 = vmul.f32 %v608_v35, %v608_v35  ;;  %v621_v6 = vmul.f32 %v609_v37, %v609_v37  ;;  %v2703_v37 = vld [vmem:[#allocation7] sm:$0xff]  }
  0x88   : > { %v638_v61 = vpack.c.bf16 %v617_v60, %v616_v59  ;;  %v622_v9 = vmul.f32 %v610_v38, %v610_v38  ;;  %v623_v10 = vmul.f32 %v611_v39, %v611_v39  ;;  %378 = vrot.lane.b32.xlu0 %v2567_v2, %s2328_s13  ;;  %vm335_vm2 = vcmask 1047680  }
  0x89   : > { %1876 = vmatmul.mubr.msk.bf16.gmra.mxu0 %vm314_vm1, %v631_v32  ;;  %v639_v1 = vpack.c.bf16 %v619_v63, %v618_v62  ;;  %v640_v8 = vpack.c.bf16 %v621_v6, %v620_v5  ;;  %380 = vrot.lane.b32.xlu1 %v2570_v3, %s2328_s13  ;;  %vm482_vm3 = vcmask 7168   ;;  %vm572_vm5 = vcmask 122880  }
  0x8a   : > { %1879 = vmatprep.mubr.msk.bf16.mxu0 %vm2326_vm0, %v2325_v0  ;;  %v641_v11 = vpack.c.bf16 %v623_v10, %v622_v9 }
  0x8d   : > { %382 = vrot.lane.b32.xlu1 %v2573_v4, %s2328_s13 }
  0x91   : > { %1880 = vmatmul.mubr.msk.bf16.gmra.mxu0 %vm314_vm1, %v632_v49 }
  0x92   : > { %1883 = vmatprep.mubr.msk.bf16.mxu0 %vm2326_vm0, %v2325_v0 }
  0x99   : > { %1884 = vmatmul.mubr.msk.bf16.gmra.mxu0 %vm314_vm1, %v633_v50 }
  0x9a   : > { %1887 = vmatprep.mubr.msk.bf16.mxu0 %vm2326_vm0, %v2325_v0 }
  0xa1   : > { %1888 = vmatmul.mubr.msk.bf16.gmra.mxu0 %vm314_vm1, %v634_v51 }
  0xa2   : > { %1891 = vmatprep.mubr.msk.bf16.mxu0 %vm2326_vm0, %v2325_v0 }
  0xa9   : > { %1892 = vmatmul.mubr.msk.bf16.gmra.mxu0 %vm314_vm1, %v635_v52 }
  0xaa   : > { %1895 = vmatprep.mubr.msk.bf16.mxu0 %vm2326_vm0, %v2325_v0 }
  0xb1   : > { %1896 = vmatmul.mubr.msk.bf16.gmra.mxu0 %vm314_vm1, %v636_v55 }
  0xb2   : > { %1899 = vmatprep.mubr.msk.bf16.mxu0 %vm2326_vm0, %v2325_v0 }
  0xb9   : > { %1900 = vmatmul.mubr.msk.bf16.gmra.mxu0 %vm314_vm1, %v637_v58 }
  0xba   : > { %1903 = vmatprep.mubr.msk.bf16.mxu0 %vm2326_vm0, %v2325_v0 }
  0xc1   : > { %1904 = vmatmul.mubr.msk.bf16.gmra.mxu0 %vm314_vm1, %v638_v61 }
  0xc2   : > { %1907 = vmatprep.mubr.msk.bf16.mxu0 %vm2326_vm0, %v2325_v0 }
  0xc9   : > { %1908 = vmatmul.mubr.msk.bf16.gmra.mxu0 %vm314_vm1, %v639_v1 }
  0xca   : > { %1911 = vmatprep.mubr.msk.bf16.mxu0 %vm2326_vm0, %v2325_v0 }
  0xd1   : > { %1912 = vmatmul.mubr.msk.bf16.gmra.mxu0 %vm314_vm1, %v640_v8 }
  0xd2   : > { %1915 = vmatprep.mubr.msk.bf16.mxu0 %vm2326_vm0, %v2325_v0 }
  0xd9   : > { %1916 = vmatmul.mubr.msk.bf16.gmra.mxu0 %vm314_vm1, %v641_v11 }
  0xda   : > { %1919 = vmatprep.mubr.msk.bf16.mxu0 %vm2326_vm0, %v2325_v0 }
  0xe1   : > { %1920 = vmatmul.mubr.msk.bf16.gmra.mxu0 %vm314_vm1, %v642_v46 }
  0xe2   : > { %1923 = vmatprep.mubr.msk.bf16.mxu0 %vm2326_vm0, %v2325_v0 }
  0xe9   : > { %1924 = vmatmul.mubr.msk.bf16.gmra.mxu0 %vm314_vm1, %v643_v47 }
  0xea   : > { %1927 = vmatprep.mubr.msk.bf16.mxu0 %vm2326_vm0, %v2325_v0 }
  0xee   : > { %v337_v18 = vpop.permute.xlu0 %336 }
  0xef   : > { %v338_v21 = vsel %vm335_vm2, %v337_v18, %v2567_v2  ;;  %v343_v24 = vpop.permute.xlu1 %342 }
  0xf0   : > { %354 = vrot.lane.b32.xlu0 %v338_v21, %s2327_s21  ;;  %v344_v25 = vsel %vm335_vm2, %v343_v24, %v2573_v4 }
  0xf1   : > { %1928 = vmatmul.mubr.msk.bf16.gmra.mxu0 %vm314_vm1, %v644_v48 }
  0xf2   : > { %v340_v22 = vpop.permute.xlu0 %339 }
  0xf3   : > { %v341_v23 = vsel %vm335_vm2, %v340_v22, %v2570_v3  ;;  %v346_v26 = vpop.permute.xlu1 %345 }
  0xf4   : > { %356 = vrot.lane.b32.xlu1 %v341_v23, %s2327_s21  ;;  %358 = vrot.lane.b32.xlu0 %v344_v25, %s2327_s21  ;;  %v347_v27 = vsel %vm335_vm2, %v346_v26, %v2578_v7 }
  0xf6   : > { %v349_v28 = vpop.permute.xlu0 %348 }
  0xf7   : > { %v350_v29 = vsel %vm335_vm2, %v349_v28, %v2587_v12  ;;  %v352_v30 = vpop.permute.xlu1 %351 }
  0xf8   : > { %384 = vrot.lane.b32.xlu1 %v2578_v7, %s2328_s13  ;;  %360 = vrot.lane.b32.xlu0 %v347_v27, %s2327_s21  ;;  %v353_v31 = vsel %vm335_vm2, %v352_v30, %v2590_v13 }
  0xfa   : > { %v379_v55 = vpop.permute.xlu0 %378 }
  0xfb   : > { %v381_v54 = vpop.permute.xlu1 %380 }
  0xfc   : > { %386 = vrot.lane.b32.xlu1 %v2587_v12, %s2328_s13  ;;  %362 = vrot.lane.b32.xlu0 %v350_v29, %s2327_s21 }
  0xff   : > { %v383_v59 = vpop.permute.xlu1 %382 }
 0x100   : > { %388 = vrot.lane.b32.xlu1 %v2590_v13, %s2328_s13  ;;  %364 = vrot.lane.b32.xlu0 %v353_v31, %s2327_s21  ;;  %s1654_s21 = scalar_lea.hbm %s2968_s4, %s1814_s6  ;;  %s1643_s13 = scalar_lea.sflag [#allocation4], %s2535_s0 }
 0x104   : > { %452 = vrot.lane.b32.xlu0 %v2567_v2, %s2329_s24  ;;  %454 = vrot.lane.b32.xlu1 %v2570_v3, %s2329_s24 }
 0x108   : > { %456 = vrot.lane.b32.xlu0 %v2573_v4, %s2329_s24  ;;  %458 = vrot.lane.b32.xlu1 %v2578_v7, %s2329_s24 }
 0x10c   : > { %460 = vrot.lane.b32.xlu1 %v2587_v12, %s2329_s24 }
 0x141   : > { %v732_v32 = vpop.f32.mrf.mxu0 }
 0x143   : > { %v1873_v33 = vpop.f32.mrf.mxu0 }
 0x145   : > { %v735_v34 = vpop.f32.mrf.mxu0 }
 0x146   : > { %v851_v35 = vpack.c.bf16 %v735_v34, %v732_v32 }
 0x147   : > { %v1874_v36 = vpop.f32.mrf.mxu0 }
 0x148   : > { %1932 = vmatpush3.bf16.msra.mxu1 %v851_v35 }
 0x149   : > { %v740_v38 = vpop.f32.mrf.mxu0  ;;  %1937 = vmatprep.subr.bf16.mxu1 %v2325_v0 }
 0x14b   : > { %v1877_v39 = vpop.f32.mrf.mxu0  ;;  %1934 = vmatmul.mubr.msk.bf16.vlgmr.msra.gmra.mxu1 %vm314_vm1, %v2703_v37 }
 0x14c   : > { %1939 = vmatprep.mubr.msk.bf16.mxu1 %vm2326_vm0, %v2325_v0 }
 0x14d   : > { %v743_v40 = vpop.f32.mrf.mxu0 }
 0x14e   : > { %v852_v41 = vpack.c.bf16 %v743_v40, %v740_v38 }
 0x14f   : > { %v1878_v42 = vpop.f32.mrf.mxu0 }
 0x150   : > { %1938 = vmatpush3.bf16.msra.mxu1 %v852_v41 }
 0x151   : > { %v748_v43 = vpop.f32.mrf.mxu0  ;;  %1943 = vmatprep.subr.bf16.mxu1 %v2325_v0 }
 0x153   : > { %v1881_v44 = vpop.f32.mrf.mxu0  ;;  %1940 = vmatmul.mubr.msk.bf16.vlgmr.msra.gmra.mxu1 %vm314_vm1, %v2703_v37 }
 0x154   : > { %1945 = vmatprep.mubr.msk.bf16.mxu1 %vm2326_vm0, %v2325_v0 }
 0x155   : > { %v751_v45 = vpop.f32.mrf.mxu0 }
 0x156   : > { %v853_v46 = vpack.c.bf16 %v751_v45, %v748_v43 }
 0x157   : > { %v1882_v47 = vpop.f32.mrf.mxu0 }
 0x158   : > { %1944 = vmatpush3.bf16.msra.mxu1 %v853_v46 }
 0x159   : > { %v756_v48 = vpop.f32.mrf.mxu0  ;;  %1949 = vmatprep.subr.bf16.mxu1 %v2325_v0 }
 0x15b   : > { %v1885_v49 = vpop.f32.mrf.mxu0  ;;  %1946 = vmatmul.mubr.msk.bf16.vlgmr.msra.gmra.mxu1 %vm314_vm1, %v2703_v37 }
 0x15c   : > { %1951 = vmatprep.mubr.msk.bf16.mxu1 %vm2326_vm0, %v2325_v0 }
 0x15d   : > { %v759_v50 = vpop.f32.mrf.mxu0 }
 0x15e   : > { %v854_v51 = vpack.c.bf16 %v759_v50, %v756_v48 }
 0x15f   : > { %v1886_v52 = vpop.f32.mrf.mxu0 }
 0x160   : > { %1950 = vmatpush3.bf16.msra.mxu1 %v854_v51 }
 0x161   : > { %v764_v53 = vpop.f32.mrf.mxu0  ;;  %1955 = vmatprep.subr.bf16.mxu1 %v2325_v0 }
 0x162   : > { %v355_v61 = vpop.permute.xlu0 %354 }
 0x163   : > { %v1889_v56 = vpop.f32.mrf.mxu0  ;;  %1952 = vmatmul.mubr.msk.bf16.vlgmr.msra.gmra.mxu1 %vm314_vm1, %v2703_v37  ;;  %v366_v63 = vsel %vm335_vm2, %v355_v61, %v2567_v2 }
 0x164   : > { %1957 = vmatprep.mubr.msk.bf16.mxu1 %vm2326_vm0, %v2325_v0  ;;  %v396_v1 = vsub.f32 %v366_v63, %v379_v55 }
 0x165   : > { %v767_v57 = vpop.f32.mrf.mxu0 }
 0x166   : > { %v855_v58 = vpack.c.bf16 %v767_v57, %v764_v53  ;;  %v357_v5 = vpop.permute.xlu1 %356  ;;  %v402_v9 = vand.u32 2147483647, %v396_v1  ;;  %v359_v11 = vpop.permute.xlu0 %358 }
 0x167   : > { %v1890_v60 = vpop.f32.mrf.mxu0  ;;  %v367_v8 = vsel %vm335_vm2, %v357_v5, %v2570_v3  ;;  %v368_v21 = vsel %vm335_vm2, %v359_v11, %v2573_v4 }
 0x168   : > { %1956 = vmatpush3.bf16.msra.mxu1 %v855_v58  ;;  %v397_v10 = vsub.f32 %v367_v8, %v381_v54  ;;  %v398_v24 = vsub.f32 %v368_v21, %v383_v59  ;;  %414 = vrot.lane.b32.xlu1 %v402_v9, %s2329_s24 }
 0x169   : > { %v772_v62 = vpop.f32.mrf.mxu0  ;;  %1961 = vmatprep.subr.bf16.mxu1 %v2325_v0 }
 0x16a   : > { %v403_v23 = vand.u32 2147483647, %v397_v10  ;;  %v385_v25 = vpop.permute.xlu1 %384  ;;  %v404_v27 = vand.u32 2147483647, %v398_v24  ;;  %v361_v28 = vpop.permute.xlu0 %360 }
 0x16b   : > { %v1893_v6 = vpop.f32.mrf.mxu0  ;;  %1958 = vmatmul.mubr.msk.bf16.vlgmr.msra.gmra.mxu1 %vm314_vm1, %v2703_v37  ;;  %v369_v30 = vsel %vm335_vm2, %v361_v28, %v2578_v7 }
 0x16c   : > { %1963 = vmatprep.mubr.msk.bf16.mxu1 %vm2326_vm0, %v2325_v0  ;;  %416 = vrot.lane.b32.xlu0 %v403_v23, %s2329_s24  ;;  %v399_v31 = vsub.f32 %v369_v30, %v385_v25 }
 0x16d   : > { %v775_v18 = vpop.f32.mrf.mxu0  ;;  %462 = vrot.lane.b32.xlu1 %v2590_v13, %s2329_s24 }
 0x16e   : > { %v856_v22 = vpack.c.bf16 %v775_v18, %v772_v62  ;;  %v387_v32 = vpop.permute.xlu1 %386  ;;  %v405_v34 = vand.u32 2147483647, %v399_v31  ;;  %v363_v35 = vpop.permute.xlu0 %362 }
 0x16f   : > { %v1894_v26 = vpop.f32.mrf.mxu0  ;;  %v370_v38 = vsel %vm335_vm2, %v363_v35, %v2587_v12 }
 0x170   : > { %1962 = vmatpush3.bf16.msra.mxu1 %v856_v22  ;;  %418 = vrot.lane.b32.xlu0 %v404_v27, %s2329_s24  ;;  %v400_v40 = vsub.f32 %v370_v38, %v387_v32 }
 0x171   : > { %v780_v29 = vpop.f32.mrf.mxu0  ;;  %1967 = vmatprep.subr.bf16.mxu1 %v2325_v0 }
 0x172   : > { %v389_v42 = vpop.permute.xlu1 %388  ;;  %v406_v43 = vand.u32 2147483647, %v400_v40  ;;  %v365_v44 = vpop.permute.xlu0 %364 }
 0x173   : > { %v1897_v33 = vpop.f32.mrf.mxu0  ;;  %1964 = vmatmul.mubr.msk.bf16.vlgmr.msra.gmra.mxu1 %vm314_vm1, %v2703_v37  ;;  %v371_v46 = vsel %vm335_vm2, %v365_v44, %v2590_v13 }
 0x174   : > { %1969 = vmatprep.mubr.msk.bf16.mxu1 %vm2326_vm0, %v2325_v0  ;;  %420 = vrot.lane.b32.xlu0 %v405_v34, %s2329_s24  ;;  %v401_v47 = vsub.f32 %v371_v46, %v389_v42  ;;  %v302_v42 = vsub.f32 %v2567_v2, %v2593_v14 }
 0x175   : > { %v783_v36 = vpop.f32.mrf.mxu0 }
 0x176   : > { %v857_v39 = vpack.c.bf16 %v783_v36, %v780_v29  ;;  %v407_v49 = vand.u32 2147483647, %v401_v47  ;;  %v453_v38 = vpop.permute.xlu0 %452 }
 0x177   : > { %v1898_v41 = vpop.f32.mrf.mxu0  ;;  %v470_v47 = vsub.f32 %v2567_v2, %v453_v38 }
 0x178   : > { %1968 = vmatpush3.bf16.msra.mxu1 %v857_v39  ;;  %422 = vrot.lane.b32.xlu0 %v406_v43, %s2329_s24  ;;  %v455_v39 = vpop.permute.xlu1 %454  ;;  %v303_v43 = vsub.f32 %v2570_v3, %v2596_v15 }
 0x179   : > { %v788_v45 = vpop.f32.mrf.mxu0  ;;  %1973 = vmatprep.subr.bf16.mxu1 %v2325_v0  ;;  %424 = vrot.lane.b32.xlu1 %v407_v49, %s2329_s24  ;;  %v305_v49 = vsub.f32 %v2578_v7, %v2602_v17  ;;  %s2239_s24 = scalar_lea.vmem %s1657_s27, 128 }
 0x17a   : > { %v457_v40 = vpop.permute.xlu0 %456  ;;  %v309_v46 = vand.u32 2147483647, %v303_v43  ;;  %p2240_p12 = scmp.ne.s32.totalorder %s1657_s27, %s2239_s24 }
 0x17b   : > { %v1901_v48 = vpop.f32.mrf.mxu0  ;;  %1970 = vmatmul.mubr.msk.bf16.vlgmr.msra.gmra.mxu1 %vm314_vm1, %v2703_v37 }
 0x17c   : > { %1975 = vmatprep.mubr.msk.bf16.mxu1 %vm2326_vm0, %v2325_v0  ;;  %v459_v41 = vpop.permute.xlu1 %458  ;;  %v471_v48 = vsub.f32 %v2570_v3, %v455_v39  ;;  %p2241_p9 = pnand %p2240_p12, %p2986_p7 }
 0x17d   : > { %v791_v50 = vpop.f32.mrf.mxu0 }
 0x17e   : > { %v858_v51 = vpack.c.bf16 %v791_v50, %v788_v45  ;;  %v308_v45 = vand.u32 2147483647, %v302_v42  ;;  %p2242_p13 = pneg %p2241_p9 }
 0x17f   : > { %v1902_v52 = vpop.f32.mrf.mxu0 }
 0x180   : > { %1974 = vmatpush3.bf16.msra.mxu1 %v858_v51  ;;  %v315_v14 = vsel %vm314_vm1, %v308_v45, 0.0  ;;  %v476_v51 = vand.u32 2147483647, %v470_v47  ;;  %v316_v52 = vsel %vm314_vm1, %v309_v46, 0.0  ;;  %v504_v46 = vrot.slane %v2567_v2, 7 }
 0x181   : > { %v796_v53 = vpop.f32.mrf.mxu0  ;;  %1979 = vmatprep.subr.bf16.mxu1 %v2325_v0  ;;  %v505_v47 = vrot.slane %v2570_v3, 7 }
 0x183   : > { %v1905_v54 = vpop.f32.mrf.mxu0  ;;  %1976 = vmatmul.mubr.msk.bf16.vlgmr.msra.gmra.mxu1 %vm314_vm1, %v2703_v37 }
 0x184   : > { %1981 = vmatprep.mubr.msk.bf16.mxu1 %vm2326_vm0, %v2325_v0  ;;  %v306_v54 = vsub.f32 %v2587_v12, %v2605_v19  ;;  %v307_v19 = vsub.f32 %v2590_v13, %v2608_v20 }
 0x185   : > { %v799_v55 = vpop.f32.mrf.mxu0 }
 0x186   : > { %v859_v56 = vpack.c.bf16 %v799_v55, %v796_v53  ;;  %v477_v53 = vand.u32 2147483647, %v471_v48  ;;  %v483_v55 = vsel %vm482_vm3, %v476_v51, 0.0  ;;  %v506_v48 = vrot.slane %v2573_v4, 7 }
 0x187   : > { %v1906_v57 = vpop.f32.mrf.mxu0 }
 0x188   : > { %1980 = vmatpush3.bf16.msra.mxu1 %v859_v56  ;;  %v311_v57 = vand.u32 2147483647, %v305_v49  ;;  %v509_v49 = vrot.slane %v2590_v13, 7 }
 0x189   : > { %v804_v58 = vpop.f32.mrf.mxu0  ;;  %1985 = vmatprep.subr.bf16.mxu1 %v2325_v0 }
 0x18b   : > { %v1909_v59 = vpop.f32.mrf.mxu0  ;;  %1982 = vmatmul.mubr.msk.bf16.vlgmr.msra.gmra.mxu1 %vm314_vm1, %v2703_v37 }
 0x18c   : > { %1987 = vmatprep.mubr.msk.bf16.mxu1 %vm2326_vm0, %v2325_v0  ;;  %v484_v59 = vsel %vm482_vm3, %v477_v53, 0.0  ;;  %v552_v53 = vrot.slane %v2587_v12, 1 }
 0x18d   : > { %v807_v60 = vpop.f32.mrf.mxu0 }
 0x18e   : > { %v860_v61 = vpack.c.bf16 %v807_v60, %v804_v58  ;;  %v317_v58 = vadd.f32 %v316_v52, %v315_v14  ;;  %v551_v52 = vrot.slane %v2573_v4, 1 }
 0x18f   : > { %v1910_v62 = vpop.f32.mrf.mxu0 }
 0x190   : > { %1986 = vmatpush3.bf16.msra.mxu1 %v860_v61  ;;  %v473_v61 = vsub.f32 %v2578_v7, %v459_v41  ;;  %v510_v41 = vlaneseq }
 0x191   : > { %v812_v63 = vpop.f32.mrf.mxu0  ;;  %1991 = vmatprep.subr.bf16.mxu1 %v2325_v0 }
 0x193   : > { %v1913_v1 = vpop.f32.mrf.mxu0  ;;  %1988 = vmatmul.mubr.msk.bf16.vlgmr.msra.gmra.mxu1 %vm314_vm1, %v2703_v37 }
 0x194   : > { %1993 = vmatprep.mubr.msk.bf16.mxu1 %vm2326_vm0, %v2325_v0 }
 0x195   : > { %v815_v5 = vpop.f32.mrf.mxu0 }
 0x196   : > { %v861_v6 = vpack.c.bf16 %v815_v5, %v812_v63  ;;  %v485_v63 = vadd.f32 %v484_v59, %v483_v55  ;;  %v508_v55 = vrot.slane %v2587_v12, 7  ;;  %v557_v59 = vsub.f32 %v2570_v3, %v551_v52 }
 0x197   : > { %v1914_v8 = vpop.f32.mrf.mxu0 }
 0x198   : > { %1992 = vmatpush3.bf16.msra.mxu1 %v861_v6  ;;  %v312_v6 = vand.u32 2147483647, %v306_v54 }
 0x199   : > { %v820_v9 = vpop.f32.mrf.mxu0  ;;  %1997 = vmatprep.subr.bf16.mxu1 %v2325_v0 }
 0x19b   : > { %v1917_v10 = vpop.f32.mrf.mxu0  ;;  %1994 = vmatmul.mubr.msk.bf16.vlgmr.msra.gmra.mxu1 %vm314_vm1, %v2703_v37 }
 0x19c   : > { %1999 = vmatprep.mubr.msk.bf16.mxu1 %vm2326_vm0, %v2325_v0 }
 0x19d   : > { %v823_v11 = vpop.f32.mrf.mxu0 }
 0x19e   : > { %v862_v18 = vpack.c.bf16 %v823_v11, %v820_v9  ;;  %v479_v9 = vand.u32 2147483647, %v473_v61 }
 0x19f   : > { %v1918_v21 = vpop.f32.mrf.mxu0 }
 0x1a0   : > { %1998 = vmatpush3.bf16.msra.mxu1 %v862_v18 }
 0x1a1   : > { %v828_v22 = vpop.f32.mrf.mxu0  ;;  %2003 = vmatprep.subr.bf16.mxu1 %v2325_v0 }
 0x1a3   : > { %v1921_v23 = vpop.f32.mrf.mxu0  ;;  %2000 = vmatmul.mubr.msk.bf16.vlgmr.msra.gmra.mxu1 %vm314_vm1, %v2703_v37 }
 0x1a4   : > { %2005 = vmatprep.mubr.msk.bf16.mxu1 %vm2326_vm0, %v2325_v0  ;;  %v313_v23 = vand.u32 2147483647, %v307_v19 }
 0x1a5   : > { %v831_v24 = vpop.f32.mrf.mxu0 }
 0x1a6   : > { %v863_v25 = vpack.c.bf16 %v831_v24, %v828_v22 }
 0x1a7   : > { %v1922_v26 = vpop.f32.mrf.mxu0 }
 0x1a8   : > { %2004 = vmatpush3.bf16.msra.mxu1 %v863_v25  ;;  %v488_v25 = vsel %vm482_vm3, %v479_v9, 0.0 }
 0x1a9   : > { %v836_v27 = vpop.f32.mrf.mxu0  ;;  %2009 = vmatprep.subr.bf16.mxu1 %v2325_v0 }
 0x1ab   : > { %v1925_v28 = vpop.f32.mrf.mxu0  ;;  %2006 = vmatmul.mubr.msk.bf16.vlgmr.msra.gmra.mxu1 %vm314_vm1, %v2703_v37 }
 0x1ac   : > { %2011 = vmatprep.mubr.msk.bf16.mxu1 %vm2326_vm0, %v2325_v0 }
 0x1ad   : > { %v839_v29 = vpop.f32.mrf.mxu0 }
 0x1ae   : > { %v864_v30 = vpack.c.bf16 %v839_v29, %v836_v27 }
 0x1af   : > { %v1926_v31 = vpop.f32.mrf.mxu0 }
 0x1b0   : > { %2010 = vmatpush3.bf16.msra.mxu1 %v864_v30  ;;  %v320_v31 = vsel %vm314_vm1, %v311_v57, 0.0 }
 0x1b1   : > { %v844_v32 = vpop.f32.mrf.mxu0  ;;  %2015 = vmatprep.subr.bf16.mxu1 %v2325_v0 }
 0x1b3   : > { %v1929_v33 = vpop.f32.mrf.mxu0  ;;  %2012 = vmatmul.mubr.msk.bf16.vlgmr.msra.gmra.mxu1 %vm314_vm1, %v2703_v37 }
 0x1b4   : > { %2017 = vmatprep.mubr.msk.bf16.mxu1 %vm2326_vm0, %v2325_v0  ;;  %v304_v0 = vsub.f32 %v2573_v4, %v2599_v16  ;;  %v472_v16 = vsub.f32 %v2573_v4, %v457_v40  ;;  %v324_v40 = vsel %vm314_vm1, %v313_v23, 0.0 }
 0x1b5   : > { %v847_v34 = vpop.f32.mrf.mxu0 }
 0x1b6   : > { %v865_v35 = vpack.c.bf16 %v847_v34, %v844_v32  ;;  %v310_v50 = vand.u32 2147483647, %v304_v0  ;;  %v478_v60 = vand.u32 2147483647, %v472_v16  ;;  %v322_v32 = vsel %vm314_vm1, %v312_v6, 0.0 }
 0x1b7   : > { %v1930_v36 = vpop.f32.mrf.mxu0  ;;  %v560_v6 = vand.u32 2147483647, %v557_v59 }
 0x1b8   : > { %2016 = vmatpush3.bf16.msra.mxu1 %v865_v35  ;;  %v318_v17 = vsel %vm314_vm1, %v310_v50, 0.0  ;;  %v486_v8 = vsel %vm482_vm3, %v478_v60, 0.0  ;;  %v2838_v50 = vshrl.u32 %v510_v41, 7  ;;  %v558_v60 = vsub.f32 %v2578_v7, %v552_v53 }
 0x1b9   : > { %v487_v18 = vadd.f32 %v486_v8, %v485_v63  ;;  %v319_v24 = vadd.f32 %v318_v17, %v317_v58  ;;  %v553_v17 = vrot.slane %v2567_v2, 1 }
 0x1ba   : > { %vm512_vm4 = vcmp.lt.s32.totalorder %v2838_v50, 1  ;;  %v561_v8 = vand.u32 2147483647, %v558_v60  ;;  %vm1621_vm8 = vcmp.eq.s32.totalorder %v2838_v50, 0 }
 0x1bb   : > { %2018 = vmatmul.mubr.msk.bf16.vlgmr.msra.gmra.mxu1 %vm314_vm1, %v2703_v37  ;;  %v461_v37 = vpop.permute.xlu1 %460  ;;  %v489_v28 = vadd.f32 %v488_v25, %v487_v18  ;;  %v321_v36 = vadd.f32 %v320_v31, %v319_v24  ;;  %v516_v16 = vsel %vm512_vm4, %v505_v47, %v506_v48  ;;  %v517_v54 = vsel %vm512_vm4, %v504_v46, %v505_v47 }
 0x1bc   : > { %v474_v10 = vsub.f32 %v2587_v12, %v461_v37  ;;  %v518_v57 = vsel %vm512_vm4, %v509_v49, %v504_v46  ;;  %v520_v58 = vsub.f32 %v517_v54, %v2570_v3  ;;  %v521_v63 = vsub.f32 %v516_v16, %v2573_v4 }
 0x1bd   : > { %v323_v43 = vadd.f32 %v322_v32, %v321_v36  ;;  %v519_v61 = vsub.f32 %v518_v57, %v2567_v2  ;;  %v559_v19 = vsub.f32 %v2590_v13, %v553_v17  ;;  %v513_v3 = vsel %vm512_vm4, %v508_v55, %v509_v49 }
 0x1be   : > { %v480_v26 = vand.u32 2147483647, %v474_v10  ;;  %v527_v2 = vand.u32 2147483647, %v521_v63  ;;  %v524_v4 = vsub.f32 %v513_v3, %v2590_v13 }
 0x1bf   : > { %v325_v37 = vadd.f32 %v324_v40, %v323_v43  ;;  %v525_v10 = vand.u32 2147483647, %v519_v61  ;;  %v562_v18 = vand.u32 2147483647, %v559_v19 }
 0x1c0   : > { %v490_v33 = vsel %vm482_vm3, %v480_v26, 0.0 }
 0x1c1   : > { %326 = vadd.xlane.f32.xlu0 %v325_v37  ;;  %v568_v24 = vrot.slane %v562_v18, 7 }
 0x1da   : > { %v415_v56 = vpop.permute.xlu1 %414 }
 0x1db   : > { %v432_v1 = vsel %vm314_vm1, %v415_v56, 0.0 }
 0x1de   : > { %v417_v44 = vpop.permute.xlu0 %416 }
 0x1df   : > { %v433_v62 = vsel %vm314_vm1, %v417_v44, 0.0  ;;  %v463_v22 = vpop.permute.xlu1 %462  ;;  %v491_v44 = vadd.f32 %v490_v33, %v489_v28  ;;  %v534_v28 = vsel %vm314_vm1, %v527_v2, 0.0 }
 0x1e0   : > { %v434_v21 = vadd.f32 %v433_v62, %v432_v1  ;;  %v475_v20 = vsub.f32 %v2590_v13, %v463_v22  ;;  %v567_v22 = vrot.slane %v561_v8, 7 }
 0x1e2   : > { %v419_v15 = vpop.permute.xlu0 %418  ;;  %v481_v34 = vand.u32 2147483647, %v475_v20  ;;  %v574_v26 = vsel %vm572_vm5, %v567_v22, 0.0 }
 0x1e3   : > { %v435_v11 = vsel %vm314_vm1, %v419_v15, 0.0  ;;  %v507_v15 = vrot.slane %v2578_v7, 7 }
 0x1e4   : > { %v436_v29 = vadd.f32 %v435_v11, %v434_v21  ;;  %v492_v45 = vsel %vm482_vm3, %v481_v34, 0.0  ;;  %v566_v21 = vrot.slane %v560_v6, 7 }
 0x1e5   : > { %v493_v51 = vadd.f32 %v492_v45, %v491_v44  ;;  %v515_v56 = vsel %vm512_vm4, %v506_v48, %v507_v15  ;;  %v514_v62 = vsel %vm512_vm4, %v507_v15, %v508_v55 }
 0x1e6   : > { %v421_v5 = vpop.permute.xlu0 %420  ;;  %v522_v1 = vsub.f32 %v515_v56, %v2578_v7  ;;  %v523_v9 = vsub.f32 %v514_v62, %v2587_v12  ;;  %v531_v7 = vsel %vm314_vm1, %v525_v10, 0.0  ;;  %v573_v25 = vsel %vm572_vm5, %v566_v21, 0.0 }
 0x1e7   : > { %v437_v27 = vsel %vm314_vm1, %v421_v5, 0.0  ;;  %494 = vadd.xlane.f32.xlu0 %v493_v51  ;;  %v526_v5 = vand.u32 2147483647, %v520_v58 }
 0x1e8   : > { %v438_v38 = vadd.f32 %v437_v27, %v436_v29  ;;  %v528_v11 = vand.u32 2147483647, %v522_v1  ;;  %v529_v12 = vand.u32 2147483647, %v523_v9  ;;  %v575_v27 = vadd.f32 %v574_v26, %v573_v25 }
 0x1e9   : > { %v532_v23 = vsel %vm314_vm1, %v526_v5, 0.0  ;;  %v576_v29 = vsel %vm572_vm5, %v568_v24, 0.0 }
 0x1ea   : > { %v423_v30 = vpop.permute.xlu0 %422  ;;  %v533_v20 = vadd.f32 %v532_v23, %v531_v7  ;;  %v536_v31 = vsel %vm314_vm1, %v528_v11, 0.0  ;;  %v577_v32 = vadd.f32 %v576_v29, %v575_v27  ;;  %v538_v13 = vsel %vm314_vm1, %v529_v12, 0.0 }
 0x1eb   : > { %v439_v35 = vsel %vm314_vm1, %v423_v30, 0.0  ;;  %v425_v39 = vpop.permute.xlu1 %424  ;;  %v530_v30 = vand.u32 2147483647, %v524_v4 }
 0x1ec   : > { %v441_v42 = vsel %vm314_vm1, %v425_v39, 0.0  ;;  %v440_v0 = vadd.f32 %v439_v35, %v438_v38  ;;  %v535_v33 = vadd.f32 %v534_v28, %v533_v20 }
 0x1ed   : > { %v540_v35 = vsel %vm314_vm1, %v530_v30, 0.0 }
 0x1ee   : > { %v442_v14 = vadd.f32 %v441_v42, %v440_v0  ;;  %v537_v34 = vadd.f32 %v536_v31, %v535_v33 }
 0x1f0   : > { %443 = vadd.xlane.f32.xlu1 %v442_v14  ;;  %v539_v36 = vadd.f32 %v538_v13, %v537_v34 }
 0x1f2   : > { %v541_v38 = vadd.f32 %v540_v35, %v539_v36 }
 0x1f4   : > { %578 = vadd.xlane.f32.xlu1 %v577_v32  ;;  %542 = vadd.xlane.f32.xlu0 %v541_v38 }
 0x20b   : > { %v910_v39 = vpop.f32.mrf.mxu1 }
 0x20c   : > { %v1491_v51 = vmul.f32 %v910_v39, %v910_v39 }
 0x20d   : > { %v1935_v40 = vpop.f32.mrf.mxu1 }
 0x20f   : > { %v913_v42 = vpop.f32.mrf.mxu1 }
 0x210   : > { %v1492_v55 = vmul.f32 %v913_v42, %v913_v42 }
 0x211   : > { %v1936_v43 = vpop.f32.mrf.mxu1 }
 0x213   : > { %v951_v44 = vpop.f32.mrf.mxu1 }
 0x215   : > { %v1941_v0 = vpop.f32.mrf.mxu1 }
 0x216   : > { %v1493_v0 = vmul.f32 %v951_v44, %v951_v44 }
 0x217   : > { %v2873_v45 = vpop.f32.mrf.mxu1 }
 0x219   : > { %v1942_v46 = vpop.f32.mrf.mxu1 }
 0x21b   : > { %v2875_v47 = vpop.f32.mrf.mxu1 }
 0x21d   : > { %v1947_v37 = vpop.f32.mrf.mxu1 }
 0x21f   : > { %v2877_v48 = vpop.f32.mrf.mxu1 }
 0x221   : > { %v1948_v49 = vpop.f32.mrf.mxu1 }
 0x223   : > { %v1033_v14 = vpop.f32.mrf.mxu1 }
 0x224   : > { %v1497_v15 = vmul.f32 %v1033_v14, %v1033_v14  ;;  %v2879_v52 = vmul.f32 %v1033_v14, %v910_v39 }
 0x225   : > { %v1953_v53 = vpop.f32.mrf.mxu1 }
 0x226   : > { %v1557_v16 = vadd.f32 %v1497_v15, %v1491_v51  ;;  %v1494_v53 = vmul.f32 %v2873_v45, %v2873_v45 }
 0x227   : > { %v1036_v54 = vpop.f32.mrf.mxu1 }
 0x228   : > { %v1498_v56 = vmul.f32 %v1036_v54, %v1036_v54  ;;  %v2881_v57 = vmul.f32 %v1036_v54, %v913_v42  ;;  %v1563_v31 = vadd.f32 0.0001, %v1557_v16 }
 0x229   : > { %v1954_v58 = vpop.f32.mrf.mxu1 }
 0x22a   : > { %v1558_v17 = vadd.f32 %v1498_v56, %v1492_v55 }
 0x22b   : > { %v1074_v59 = vpop.f32.mrf.mxu1 }
 0x22c   : > { %v2883_v60 = vmul.f32 %v1074_v59, %v951_v44  ;;  %v1564_v39 = vadd.f32 0.0001, %v1558_v17  ;;  %v1499_v40 = vmul.f32 %v1074_v59, %v1074_v59  ;;  %v1495_v17 = vmul.f32 %v2875_v47, %v2875_v47 }
 0x22d   : > { %v1959_v61 = vpop.f32.mrf.mxu1 }
 0x22f   : > { %v1077_v62 = vpop.f32.mrf.mxu1 }
 0x230   : > { %v2886_v63 = vmul.f32 %v1077_v62, %v2873_v45  ;;  %v1500_v14 = vmul.f32 %v1077_v62, %v1077_v62  ;;  %v1496_v45 = vmul.f32 %v2877_v48, %v2877_v48 }
 0x231   : > { %v1960_v1 = vpop.f32.mrf.mxu1 }
 0x233   : > { %v1115_v5 = vpop.f32.mrf.mxu1 }
 0x234   : > { %v2889_v19 = vmul.f32 %v1115_v5, %v2875_v47  ;;  %v1501_v58 = vmul.f32 %v1115_v5, %v1115_v5  ;;  %v1527_v47 = vmul.f32 2.0, %v2879_v52 }
 0x235   : > { %v1965_v6 = vpop.f32.mrf.mxu1 }
 0x237   : > { %v1118_v8 = vpop.f32.mrf.mxu1 }
 0x238   : > { %v2892_v9 = vmul.f32 %v1118_v8, %v2877_v48  ;;  %v1502_v62 = vmul.f32 %v1118_v8, %v1118_v8 }
 0x239   : > { %v1966_v3 = vpop.f32.mrf.mxu1 }
 0x23b   : > { %v1156_v10 = vpop.f32.mrf.mxu1 }
 0x23c   : > { %v1509_v27 = vsub.f32 %v1156_v10, %v1491_v51 }
 0x23d   : > { %v1971_v2 = vpop.f32.mrf.mxu1 }
 0x23e   : > { %v1560_v2 = vadd.f32 %v1500_v14, %v1494_v53 }
 0x23f   : > { %v1159_v11 = vpop.f32.mrf.mxu1 }
 0x240   : > { %v1510_v32 = vsub.f32 %v1159_v11, %v1492_v55 }
 0x241   : > { %v1972_v18 = vpop.f32.mrf.mxu1 }
 0x243   : > { %v1197_v21 = vpop.f32.mrf.mxu1 }
 0x244   : > { %v1511_v51 = vsub.f32 %v1197_v21, %v1493_v0 }
 0x245   : > { %v1977_v22 = vpop.f32.mrf.mxu1 }
 0x247   : > { %v1200_v4 = vpop.f32.mrf.mxu1 }
 0x248   : > { %v1512_v61 = vsub.f32 %v1200_v4, %v1494_v53 }
 0x249   : > { %v1978_v7 = vpop.f32.mrf.mxu1 }
 0x24b   : > { %v1238_v23 = vpop.f32.mrf.mxu1 }
 0x24c   : > { %v1513_v11 = vsub.f32 %v1238_v23, %v1495_v17 }
 0x24d   : > { %v1983_v24 = vpop.f32.mrf.mxu1 }
 0x24f   : > { %v1241_v25 = vpop.f32.mrf.mxu1 }
 0x250   : > { %v1514_v7 = vsub.f32 %v1241_v25, %v1496_v45 }
 0x251   : > { %v1984_v26 = vpop.f32.mrf.mxu1 }
 0x252   : > { %v1566_v26 = vadd.f32 0.0001, %v1560_v2 }
 0x253   : > { %v1279_v12 = vpop.f32.mrf.mxu1 }
 0x254   : > { %v1515_v20 = vsub.f32 %v1279_v12, %v1497_v15  ;;  %v1561_v12 = vadd.f32 %v1501_v58, %v1495_v17 }
 0x255   : > { %v1989_v28 = vpop.f32.mrf.mxu1 }
 0x256   : > { %v1569_v29 = vadd.f32 %v1515_v20, %v1509_v27 }
 0x257   : > { %v1282_v30 = vpop.f32.mrf.mxu1 }
 0x258   : > { %v1575_v33 = vadd.f32 0.0009, %v1569_v29  ;;  %v1516_v13 = vsub.f32 %v1282_v30, %v1498_v56  ;;  %v1559_v56 = vadd.f32 %v1499_v40, %v1493_v0  ;;  %v1533_v29 = vadd.f32 0.0001, %v1527_v47 }
 0x259   : > { %v1990_v34 = vpop.f32.mrf.mxu1  ;;  %v1562_v30 = vadd.f32 %v1502_v62, %v1496_v45 }
 0x25a   : > { %v1581_v35 = vmul.f32 %v1575_v33, %v1563_v31  ;;  %v1570_v36 = vadd.f32 %v1516_v13, %v1510_v32  ;;  %v1565_v10 = vadd.f32 0.0001, %v1559_v56  ;;  %v1528_v32 = vmul.f32 2.0, %v2881_v57 }
 0x25b   : > { %v1320_v38 = vpop.f32.mrf.mxu1  ;;  %v1567_v33 = vadd.f32 0.0001, %v1561_v12 }
 0x25c   : > { %v1576_v42 = vadd.f32 0.0009, %v1570_v36  ;;  %v1517_v37 = vsub.f32 %v1320_v38, %v1499_v40  ;;  %2119 = vrcp.f32 %v1581_v35  ;;  %v1529_v40 = vmul.f32 2.0, %v2883_v60 }
 0x25d   : > { %v1995_v43 = vpop.f32.mrf.mxu1  ;;  %v1534_v0 = vadd.f32 0.0001, %v1528_v32 }
 0x25e   : > { %v1582_v46 = vmul.f32 %v1576_v42, %v1564_v39  ;;  %v1571_v16 = vadd.f32 %v1517_v37, %v1511_v51  ;;  %v1568_v42 = vadd.f32 0.0001, %v1562_v30 }
 0x25f   : > { %v1323_v49 = vpop.f32.mrf.mxu1 }
 0x260   : > { %v1518_v54 = vsub.f32 %v1323_v49, %v1500_v14  ;;  %v1577_v44 = vadd.f32 0.0009, %v1571_v16  ;;  %2121 = vrcp.f32 %v1582_v46  ;;  %v1535_v16 = vadd.f32 0.0001, %v1529_v40 }
 0x261   : > { %v1996_v15 = vpop.f32.mrf.mxu1 }
 0x262   : > { %v1572_v1 = vadd.f32 %v1518_v54, %v1512_v61  ;;  %v1583_v5 = vmul.f32 %v1577_v44, %v1565_v10 }
 0x263   : > { %v1361_v55 = vpop.f32.mrf.mxu1 }
 0x264   : > { %v1519_v6 = vsub.f32 %v1361_v55, %v1501_v58  ;;  %v1578_v22 = vadd.f32 0.0009, %v1572_v1  ;;  %2123 = vrcp.f32 %v1583_v5  ;;  %v1530_v55 = vmul.f32 2.0, %v2886_v63 }
 0x265   : > { %v2001_v59 = vpop.f32.mrf.mxu1 }
 0x266   : > { %v1573_v4 = vadd.f32 %v1519_v6, %v1513_v11  ;;  %v1584_v23 = vmul.f32 %v1578_v22, %v1566_v26  ;;  %v1536_v2 = vadd.f32 0.0001, %v1530_v55 }
 0x267   : > { %v1364_v3 = vpop.f32.mrf.mxu1 }
 0x268   : > { %v1520_v18 = vsub.f32 %v1364_v3, %v1502_v62  ;;  %v1579_v28 = vadd.f32 0.0009, %v1573_v4  ;;  %2125 = vrcp.f32 %v1584_v23  ;;  %v1531_v62 = vmul.f32 2.0, %v2889_v19  ;;  %v327_v4 = vpop.xlane.xlu0 %326 }
 0x269   : > { %v2002_v21 = vpop.f32.mrf.mxu1  ;;  %v2120_v39 = vpop.eup %2119 }
 0x26a   : > { %v1574_v27 = vadd.f32 %v1520_v18, %v1514_v7  ;;  %v1585_v36 = vmul.f32 %v1579_v28, %v1567_v33  ;;  %v1537_v7 = vadd.f32 0.0001, %v1531_v62 }
 0x26b   : > { %v1402_v24 = vpop.f32.mrf.mxu1 }
 0x26c   : > { %v1521_v8 = vsub.f32 %v1402_v24, %v2879_v52  ;;  %v1580_v34 = vadd.f32 0.0009, %v1574_v27  ;;  %2127 = vrcp.f32 %v1585_v36  ;;  %v1532_v24 = vmul.f32 2.0, %v2892_v9 }
 0x26d   : > { %v2007_v20 = vpop.f32.mrf.mxu1  ;;  %v2122_v53 = vpop.eup %2121 }
 0x26e   : > { %v1539_v48 = vmul.f32 2.0, %v1521_v8  ;;  %v1586_v14 = vmul.f32 %v1580_v34, %v1568_v42  ;;  %v328_v8 = vrot.slane %v327_v4, 4 }
 0x26f   : > { %v1405_v31 = vpop.f32.mrf.mxu1 }
 0x270   : > { %v1545_v13 = vadd.f32 0.0009, %v1539_v48  ;;  %v1522_v25 = vsub.f32 %v1405_v31, %v2881_v57  ;;  %2129 = vrcp.f32 %v1586_v14 }
 0x271   : > { %v2008_v35 = vpop.f32.mrf.mxu1  ;;  %v2124_v6 = vpop.eup %2123 }
 0x272   : > { %v1551_v52 = vmul.f32 %v1545_v13, %v1533_v29  ;;  %v1540_v38 = vmul.f32 2.0, %v1522_v25  ;;  %v329_v29 = vadd.f32 %v328_v8, %v327_v4  ;;  %v495_v13 = vpop.xlane.xlu0 %494 }
 0x273   : > { %v1443_v43 = vpop.f32.mrf.mxu1  ;;  %v496_v36 = vrot.slane %v495_v13, 4 }
 0x274   : > { %v1593_v46 = vmul.f32 %v2120_v39, %v1551_v52  ;;  %v1546_v37 = vadd.f32 0.0009, %v1540_v38  ;;  %v1523_v49 = vsub.f32 %v1443_v43, %v2883_v60  ;;  %v330_v35 = vrot.slane %v329_v29, 2 }
 0x275   : > { %v2013_v51 = vpop.f32.mrf.mxu1  ;;  %v2126_v47 = vpop.eup %2125  ;;  %v1538_v52 = vadd.f32 0.0001, %v1532_v24  ;;  %v497_v42 = vadd.f32 %v496_v36, %v495_v13 }
 0x276   : > { %v1552_v57 = vmul.f32 %v1546_v37, %v1534_v0  ;;  %v1541_v15 = vmul.f32 2.0, %v1523_v49  ;;  %v1599_v59 = vsel %vm314_vm1, %v1593_v46, 0.0  ;;  %v331_v43 = vadd.f32 %v330_v35, %v329_v29 }
 0x277   : > { %v1446_v54 = vpop.f32.mrf.mxu1  ;;  %v498_v14 = vrot.slane %v497_v42, 2 }
 0x278   : > { %v1594_v56 = vmul.f32 %v2122_v53, %v1552_v57  ;;  %v1547_v58 = vadd.f32 0.0009, %v1541_v15  ;;  %v1524_v61 = vsub.f32 %v1446_v54, %v2886_v63  ;;  %v332_v51 = vrot.slane %v331_v43, 1 }
 0x279   : > { %v2014_v17 = vpop.f32.mrf.mxu1  ;;  %v444_v27 = vpop.xlane.xlu1 %443 }
 0x27a   : > { %v1600_v60 = vsel %vm314_vm1, %v1594_v56, 0.0  ;;  %v1553_v44 = vmul.f32 %v1547_v58, %v1535_v16  ;;  %v1542_v1 = vmul.f32 2.0, %v1524_v61  ;;  %v445_v48 = vrot.slane %v444_v27, 4  ;;  %v2128_v25 = vpop.eup %2127 }
 0x27b   : > { %v1601_v3 = vadd.f32 %v1600_v60, %v1599_v59  ;;  %v1484_v10 = vpop.f32.mrf.mxu1  ;;  %v333_v53 = vadd.f32 %v332_v51, %v331_v43  ;;  %v499_v16 = vadd.f32 %v498_v14, %v497_v42 }
 0x27c   : > { %v1595_v11 = vmul.f32 %v2124_v6, %v1553_v44  ;;  %v1548_v45 = vadd.f32 0.0009, %v1542_v1  ;;  %v1525_v18 = vsub.f32 %v1484_v10, %v2889_v19  ;;  %v446_v33 = vadd.f32 %v445_v48, %v444_v27 }
 0x27d   : > { %v2019_v21 = vpop.f32.mrf.mxu1  ;;  %2024 = vpush %v333_v53  ;;  %v500_v58 = vrot.slane %v499_v16, 1  ;;  %v579_v61 = vpop.xlane.xlu1 %578 }
 0x27e   : > { %v1602_v63 = vsel %vm314_vm1, %v1595_v11, 0.0  ;;  %v1554_v5 = vmul.f32 %v1548_v45, %v1536_v2  ;;  %v1543_v22 = vmul.f32 2.0, %v1525_v18  ;;  %v447_v40 = vrot.slane %v446_v33, 2  ;;  %v543_v1 = vpop.xlane.xlu0 %542 }
 0x27f   : > { %v1487_v26 = vpop.f32.mrf.mxu1  ;;  %v1603_v12 = vadd.f32 %v1602_v63, %v1601_v3  ;;  %v501_v17 = vadd.f32 %v500_v58, %v499_v16  ;;  %v580_v59 = vrot.slane %v579_v61, 4  ;;  %v544_v6 = vrot.slane %v543_v1, 4 }
 0x280   : > { %v1596_v20 = vmul.f32 %v2126_v47, %v1554_v5  ;;  %v1549_v23 = vadd.f32 0.0009, %v1543_v22  ;;  %v1526_v28 = vsub.f32 %v1487_v26, %v2892_v9  ;;  %v2130_v9 = vpop.eup %2129  ;;  %v448_v37 = vadd.f32 %v447_v40, %v446_v33 }
 0x281   : > { %v2020_v19 = vpop.f32.mrf.mxu1  ;;  %v581_v60 = vadd.f32 %v580_v59, %v579_v61  ;;  %v545_v3 = vadd.f32 %v544_v6, %v543_v1  ;;  %v1620_v26 = vand.u32 127, %v510_v41 }
 0x282   : > { %v1555_v30 = vmul.f32 %v1549_v23, %v1537_v7  ;;  %v1544_v31 = vmul.f32 2.0, %v1526_v28  ;;  %v1604_v32 = vsel %vm314_vm1, %v1596_v20, 0.0  ;;  %v449_v15 = vrot.slane %v448_v37, 1 }
 0x283   : > { %v1605_v34 = vadd.f32 %v1604_v32, %v1603_v12  ;;  %v582_v44 = vrot.slane %v581_v60, 2  ;;  %v546_v10 = vrot.slane %v545_v3, 2  ;;  %vm1622_vm6 = vcmp.eq.s32.totalorder %v1620_v26, 0 }
 0x284   : > { %v1597_v38 = vmul.f32 %v2128_v25, %v1555_v30  ;;  %v1550_v39 = vadd.f32 0.0009, %v1544_v31  ;;  %v450_v55 = vadd.f32 %v449_v15, %v448_v37  ;;  %vm1626_vm7 = vcmp.eq.s32.totalorder %v1620_v26, 1  ;;  %vm1623_vm9 = vmand %vm1621_vm8, %vm1622_vm6 }
 0x285   : > { %v583_v62 = vadd.f32 %v582_v44, %v581_v60  ;;  %v547_v11 = vadd.f32 %v546_v10, %v545_v3  ;;  %vm1631_vm10 = vcmp.eq.s32.totalorder %v1620_v26, 2  ;;  %vm1627_vm11 = vmand %vm1621_vm8, %vm1626_vm7  ;;  %vm1636_vm12 = vcmp.eq.s32.totalorder %v1620_v26, 3 }
 0x286   : > { %v1556_v0 = vmul.f32 %v1550_v39, %v1538_v52  ;;  %v1606_v46 = vsel %vm314_vm1, %v1597_v38, 0.0  ;;  %2026 = vpush %v450_v55  ;;  %vm1632_vm13 = vmand %vm1621_vm8, %vm1631_vm10 }
 0x287   : > { %v1607_v49 = vadd.f32 %v1606_v46, %v1605_v34  ;;  %2028 = vpush %v501_v17  ;;  %v584_v2 = vrot.slane %v583_v62, 1  ;;  %v548_v45 = vrot.slane %v547_v11, 1  ;;  %vm1637_vm14 = vmand %vm1621_vm8, %vm1636_vm12 }
 0x288   : > { %v1598_v57 = vmul.f32 %v2130_v9, %v1556_v0 }
 0x289   : > { %v585_v18 = vadd.f32 %v584_v2, %v583_v62  ;;  %v549_v21 = vadd.f32 %v548_v45, %v547_v11 }
 0x28a   : > { %v1608_v54 = vsel %vm314_vm1, %v1598_v57, 0.0 }
 0x28b   : > { %v1609_v56 = vadd.f32 %v1608_v54, %v1607_v49  ;;  %2030 = vpush %v549_v21 }
 0x28c   : > { %2032 = vpush %v585_v18 }
 0x28d   : > { %1610 = vadd.xlane.f32.xlu0 %v1609_v56 }
 0x2ae   : > { %s2025_s10 = spop %2024 }
 0x2af   : > { %v1624_v12 = vstv %s2025_s10  ;;  %s2330_s10 = smov [#allocation10]  }
 0x2b0   : > { %v1625_v27 = vsel %vm1623_vm9, %v1624_v12, 0.0 }
 0x2b7   : > { %s2027_s12 = spop %2026 }
 0x2b8   : > { %s2029_s8 = spop %2028 }
 0x2b9   : > { %s503_s7 = ssub.f32 %s2027_s12, %s2029_s8  ;;  %s2243_s12 = sshll.u32 %s2330_s10, 4  ;;  %s2244_s12 = int_to_ptr.vmem [resolvable:$false] %s2243_s12 }
 0x2ba   : > { %s2245_s19 = scalar_lea.vmem %s2244_s12, 256  ;;  %p2246_p5 = scmp.lt.s32.totalorder %s1657_s27, %s2244_s12 }
 0x2bb   : > { %v1633_v41 = vstv %s503_s7  ;;  %p2247_p1 = scmp.lt.s32.totalorder %s2245_s19, %s2239_s24 }
 0x2bc   : > { %s2031_s28 = spop %2030  ;;  %v1634_v48 = vsel %vm1632_vm13, %v1633_v41, 0.0 }
 0x2bd   : > { %s2033_s25 = spop %2032  ;;  %p2248_p4 = por %p2247_p1, %p2246_p5 }
 0x2be   : > { %s587_s5 = ssub.f32 %s2031_s28, %s2033_s25 }
 0x2bf   : > { %p2249_p3 = pnand %p2248_p4, %p2242_p13 }
 0x2c0   : > { %v1638_v23 = vstv %s587_s5 }
 0x2c1   : > { %v1639_v29 = vsel %vm1637_vm14, %v1638_v23, 0.0 }
 0x316   : > { %v1611_v63 = vpop.xlane.xlu0 %1610 }
 0x317   : > { %v1612_v5 = vrot.slane %v1611_v63, 4 }
 0x319   : > { %v1613_v22 = vadd.f32 %v1612_v5, %v1611_v63 }
 0x31b   : > { %v1614_v4 = vrot.slane %v1613_v22, 2 }
 0x31d   : > { %v1615_v47 = vadd.f32 %v1614_v4, %v1613_v22 }
 0x31f   : > { %v1616_v7 = vrot.slane %v1615_v47, 1 }
 0x321   : > { %v1617_v24 = vadd.f32 %v1616_v7, %v1615_v47 }
 0x323   : > { %2034 = vpush %v1617_v24 }
 0x354   : > { %s2035_s30 = spop %2034 }
 0x355   : > { %v1628_v8 = vstv %s2035_s30 }
 0x356   : > { %v1629_v20 = vsel %vm1627_vm11, %v1628_v8, 0.0 }
 0x357   : > { %v1630_v28 = vadd.f32 %v1629_v20, %v1625_v27 }
 0x359   : > { %v1635_v19 = vadd.f32 %v1634_v48, %v1630_v28 }
 0x35b   : > { %v1640_v30 = vadd.f32 %v1639_v29, %v1635_v19 }
 0x35d   : > { %1641 = vst [vmem:[%s286_s26] sm:$0xff] %v1640_v30 }
 0x35e   : > { %2252 = shalt.err (!%p2249_p3)
}
 0x35f   : > { %s2253_s8 = scalar_lea.hbm %s1654_s21, 128  ;;  %s2257_s25 = scalar_lea.hbm %s2968_s4, 256 }
 0x360   : > { %p2254_p2 = scmp.ne.s32.totalorder %s1654_s21, %s2253_s8  ;;  %p2258_p11 = scmp.lt.s32.totalorder %s1654_s21, %s2968_s4 }
 0x361   : > { %p2259_p10 = scmp.lt.s32.totalorder %s2257_s25, %s2253_s8 }
 0x362   : > { %p2255_p0 = pnand %p2254_p2, %p2986_p7 }
 0x363   : > { %p2260_p6 = por %p2259_p10, %p2258_p11 }
 0x364   : > { %p2256_p8 = pneg %p2255_p0 }
 0x366   : > { %p2261_p12 = pnand %p2260_p6, %p2256_p8 }
 0x368   : > { %2264 = shalt.err (!%p2261_p12)
}
 0x369   : > { %2048 = dma.vmem_to_hbm [thread:$0]  (%p2986_p7), %s1657_s27, 128, %s1654_s21, %s1643_s13  }
 0x36a PF: > { %s1668_s5 = sand.u32 1, %s2303_s15   ;;  %p2987_p9 = scmp.ne.s32.totalorder %s2974_s22, 0 }
 0x36b   : > { %p2988_p13 = scmp.ge.s32.totalorder %s2315_s18, 2  ;;  %s1669_s30 = scalar_lea.sflag [#allocation4], %s1668_s5 }
 0x36d   : > { %p2065_p5 = pnand %p2988_p13, %p2987_p9 }
 0x36f   : > { %p2066_p1 = pneg %p2065_p5 }
 0x371   : > { %2298 = dma.done.wait (%p2066_p1), %s1669_s30, 128  }
 0x372   : > { %2300 = vsyncadd (%p2066_p1), %s1669_s30, 4294967168  ;;  %p21_p4 = scmp.ge.s32.totalorder %s2428_s11, 4   ;;  %s2989_s15 = smov %s2307_s16 }
 0x373   : > { %s2990_s16 = smov %s2311_s17  ;;  %s2991_s17 = smov %s2444_s20 }
 0x374   : > { %s2992_s18 = smov %s2428_s11  ;;  %23 = sbr.rel (!%p21_p4) target bundleno = 10 (0xa), region = 102 }
 0x379   :  { %1674 = vsyncpa [#allocation3], 1 }
 0x37a   :  { %1676 = vsyncpa [#allocation3 + $0x1], 1 }
 0x37b   :  { %1677 = vsyncpa [#allocation6], 1 }
 0x37c   :  { %1679 = vsyncpa [#allocation6 + $0x1], 1 }
 0x37d   :  { %1680 = vsyncpa [#allocation9], 1 }
 0x37e   :  { %1681 = vsyncpa [#allocation4], 1 }
 0x37f   :  { %1683 = vsyncpa [#allocation4 + $0x1], 1 }

</bundles_post_ra>
